<compile_context>
chip_gen: v6e
topology: v6e:2x2x1
jax: 0.10.0
libtpu: 0.0.40
codegen_flags: <defaults>
</compile_context>

<pallas_src>
import functools

import jax
import jax.numpy as jnp
from jax.experimental import pallas as pl
from jax.experimental.pallas import tpu as pltpu


def _stsgcm_chunk_kernel(data_ref, temb_ref, semb_ref, adj_ref, *rest,
                         N, C, B, tw, filters, glu):
    """One grid step = all batches x `tw` consecutive sliding windows."""
    out_ref = rest[-1]
    prm = rest[:-1]                      # per-layer weights / biases
    F = filters[-1]
    M = B * tw                           # window-batch count, m = b*tw + i
    TW2 = tw + 2

    t0 = pl.program_id(0) * tw           # first window of this chunk

    # ---- fused position embedding on the chunk's time slice ---------------
    xwin = data_ref[:, pl.ds(t0, TW2), :, :]           # (B, tw+2, N, C) f32
    te = temb_ref[pl.ds(t0, TW2), :]                   # (tw+2, C)
    se = semb_ref[...]                                 # (N, C)
    xwin = xwin + te[None, :, None, :] + se[None, None, :, :]

    # ---- build the 3-step windows: h[m, k*N + n, c] ------------------------
    parts = []
    for k in range(3):
        p = xwin[:, k:k + tw, :, :]                    # (B, tw, N, C)
        parts.append(p.reshape(M, N, C))               # merge leading dims
    h = jnp.concatenate(parts, axis=1)                 # (M, 3N, C) f32

    # shared adjacency, broadcast once (hoisted out of the layer loop)
    adj_b = jnp.broadcast_to(adj_ref[...], (M, 3 * N, 3 * N))   # bf16

    acc = None
    pi = 0
    for f in filters:
        # graph aggregation over the 3N vertex axis (batched over M windows)
        h1 = jnp.einsum("mvw,mwc->mvc", adj_b, h.astype(jnp.bfloat16),
                        preferred_element_type=jnp.float32)      # (M, 3N, cin)
        cin = h1.shape[-1]
        h1f = h1.reshape(M * 3 * N, cin).astype(jnp.bfloat16)    # tile-aligned

        if glu:
            wl, wr, bl, br = prm[pi], prm[pi + 1], prm[pi + 2], prm[pi + 3]
            pi += 4
            zl = jnp.dot(h1f, wl[...], preferred_element_type=jnp.float32) + bl[...]
            zr = jnp.dot(h1f, wr[...], preferred_element_type=jnp.float32) + br[...]
            hf = zl * jax.nn.sigmoid(zr)                          # (M*3N, f) f32
        else:
            w, b = prm[pi], prm[pi + 1]
            pi += 2
            hf = jnp.maximum(
                jnp.dot(h1f, w[...], preferred_element_type=jnp.float32) + b[...],
                0.0)

        h = hf.reshape(M, 3 * N, f)                               # tile-aligned
        mid = h[:, N:2 * N, :]                                    # middle step
        acc = mid if acc is None else jnp.maximum(acc, mid)

    # ---- lane-dense store: (B, 1, tw, N*F), N*F is a multiple of 128 -------
    res = acc.reshape(B, tw, N, F)                                # m = b*tw + i
    res = jnp.concatenate([res[:, :, n, :] for n in range(N)], axis=-1)
    out_ref[...] = res.reshape(B, 1, tw, N * F).astype(out_ref.dtype)


def stsgcn_layer_sharing_forward(data, adj, params, filters, activation="GLU"):
    """data: (B, T, N, C) f32, adj: (3N, 3N) f32 -> (B, T-2, N, filters[-1])."""
    B, T, N, C = data.shape
    assert all(f == filters[0] for f in filters), "Stsgcm max requires equal filters"
    F = filters[-1]
    glu = activation == "GLU"
    n_windows = T - 2
    # >= 2 even parallel chunks when possible (v7x has 2 TensorCores).
    n_chunks = 2 if (n_windows % 2 == 0 and n_windows >= 2) else 1
    tw = n_windows // n_chunks

    temb = params["temporal_emb"].reshape(T, C).astype(jnp.float32)
    semb = params["spatial_emb"].reshape(N, C).astype(jnp.float32)
    adj_bf = adj.astype(jnp.bfloat16)

    def full_spec(shape):  # untiled, VMEM-resident (same block every step)
        return pl.BlockSpec(shape, lambda c, n=len(shape): (0,) * n)

    # Layer params: split GLU weights/biases into lhs/rhs halves in the
    # wrapper (free) so the kernel never lane-slices the (., 2F) output.
    layer_args, layer_specs = [], []
    for (w, b) in params["layers"]:
        if glu:
            f = w.shape[1] // 2
            pieces = (w[:, :f].astype(jnp.bfloat16),
                      w[:, f:].astype(jnp.bfloat16),
                      b[:, :f].astype(jnp.float32),
                      b[:, f:].astype(jnp.float32))
        else:
            pieces = (w.astype(jnp.bfloat16), b.astype(jnp.float32))
        for a in pieces:
            layer_args.append(a)
            layer_specs.append(full_spec(a.shape))

    kernel = functools.partial(_stsgcm_chunk_kernel, N=N, C=C, B=B, tw=tw,
                               filters=tuple(filters), glu=glu)

    in_specs = [full_spec((B, T, N, C)),
                full_spec((T, C)),
                full_spec((N, C)),
                full_spec((3 * N, 3 * N))] + layer_specs
    out_specs = pl.BlockSpec((B, 1, tw, N * F), lambda c: (0, c, 0, 0))

    # VMEM budget from the actual hardware (v7x: 64 MiB, v5e/v6e: 128 MiB).
    try:
        vmem_cap = int(pltpu.get_tpu_info().vmem_capacity_bytes)
    except Exception:
        vmem_cap = 64 * 1024 * 1024
    vmem_limit = int(min(vmem_cap * 3 // 4, 64 * 1024 * 1024))

    # Advisory cost estimate (data counted once).
    flops, trans, cin = 0, 0, C
    for f in filters:
        f_tot = 2 * f if glu else f
        flops += 2 * (3 * N) * (3 * N) * cin + 2 * (3 * N) * cin * f_tot
        if glu:
            trans += 3 * N * f
        cin = f
    flops *= n_windows * B
    trans *= n_windows * B
    bytes_accessed = (4 * int(data.size) + 4 * int(temb.size) + 4 * int(semb.size)
                      + 2 * int(adj.size)
                      + sum(int(a.size) * a.dtype.itemsize for a in layer_args)
                      + 4 * B * n_windows * N * F)

    out = pl.pallas_call(
        kernel,
        out_shape=jax.ShapeDtypeStruct((B, n_chunks, tw, N * F), jnp.float32),
        grid=(n_chunks,),
        in_specs=in_specs,
        out_specs=out_specs,
        compiler_params=pltpu.CompilerParams(
            dimension_semantics=("parallel",),
            vmem_limit_bytes=vmem_limit),
        cost_estimate=pl.CostEstimate(flops=int(flops),
                                      transcendentals=int(trans),
                                      bytes_accessed=int(bytes_accessed)),
    )(data, temb, semb, adj_bf, *layer_args)

    # pure reshape (no transpose): (B, n_chunks, tw, N*F) -> (B, T-2, N, F)
    return out.reshape(B, n_windows, N, F)


def init_params(key, T, N, C, filters, activation="GLU"):
    """Deterministic synthetic params. GLU weights packed as one (C_in, 2F)
    Linear (lhs = first F columns), matching the PyTorch module."""
    n_layers = len(filters)
    keys = jax.random.split(key, 2 + 2 * n_layers)

    def xavier(k, shape, fan_in, fan_out):
        bound = (6.0 / (fan_in + fan_out)) ** 0.5
        return jax.random.uniform(k, shape, jnp.float32, -bound, bound)

    params = {
        "temporal_emb": xavier(keys[0], (1, T, 1, C), T, C),
        "spatial_emb": xavier(keys[1], (1, 1, N, C), N, C),
        "layers": [],
    }
    in_f = C
    for i, f in enumerate(filters):
        f_tot = 2 * f if activation == "GLU" else f
        w = xavier(keys[2 + 2 * i], (in_f, f_tot), in_f, f_tot)
        b = 0.01 * xavier(keys[3 + 2 * i], (1, f_tot), 1, f_tot)
        params["layers"].append((w, b))
        in_f = f
    return params


def reference_forward(data, adj, params, filters, activation="GLU"):
    """Plain-JAX (f32) mirror of the PyTorch STSGCNLayerSharing.forward."""
    B, T, N, C = data.shape
    x = data + params["temporal_emb"] + params["spatial_emb"]
    windows = [x[:, i:i + 3].reshape(B, 3 * N, C) for i in range(T - 2)]
    h = jnp.concatenate(windows, axis=0)                         # (M, 3N, C)
    mids = []
    for (w, b), f in zip(params["layers"], filters):
        h = jnp.einsum("ij,mjc->mic", adj, h)
        z = h @ w + b
        if activation == "GLU":
            h = z[..., :f] * jax.nn.sigmoid(z[..., f:])
        else:
            h = jnp.maximum(z, 0.0)
        mids.append(jnp.transpose(h, (1, 0, 2))[N:2 * N][None])  # (1, N, M, f)
    g = jnp.max(jnp.concatenate(mids, axis=0), axis=0)           # (N, M, F)
    g = g.reshape(N, T - 2, B, filters[-1])
    return jnp.transpose(g, (2, 1, 0, 3))                        # (B, T-2, N, F)


if __name__ == "__main__":
    # Small shapes consistent with the module's forward.
    B, T, N, C = 2, 8, 16, 4
    filters = [16, 16]          # must all be equal (torch.cat/max in Stsgcm)
    activation = "GLU"

    key = jax.random.PRNGKey(0)
    k_data, k_adj, k_params = jax.random.split(key, 3)

    data = jax.random.normal(k_data, (B, T, N, C), jnp.float32)
    adj = jax.random.normal(k_adj, (3 * N, 3 * N), jnp.float32) * 0.1
    params = init_params(k_params, T, N, C, filters, activation)

    out = stsgcn_layer_sharing_forward(data, adj, params, filters, activation)
    out = jax.block_until_ready(out)

    assert out.shape == (B, T - 2, N, filters[-1]), out.shape
    assert out.dtype == jnp.float32

    ref = jax.block_until_ready(
        reference_forward(data, adj, params, filters, activation))
    max_err = float(jnp.max(jnp.abs(out - ref)))
    # bf16 MXU operands with f32 accumulation -> slightly loosened tolerance.
    assert jnp.allclose(out, ref, rtol=5e-2, atol=1e-2), f"max_err={max_err}"

    print("KERNEL_OK")
</pallas_src>

<mosaic_0001>
module attributes {stable_mosaic.version = 11 : i64} {
  func.func @_stsgcm_chunk_kernel(%arg0: i32, %arg1: memref<2x8x16x4xf32, #tpu.memory_space<vmem>>, %arg2: memref<8x4xf32, #tpu.memory_space<vmem>>, %arg3: memref<16x4xf32, #tpu.memory_space<vmem>>, %arg4: memref<48x48xbf16, #tpu.memory_space<vmem>>, %arg5: memref<4x16xbf16, #tpu.memory_space<vmem>>, %arg6: memref<4x16xbf16, #tpu.memory_space<vmem>>, %arg7: memref<1x16xf32, #tpu.memory_space<vmem>>, %arg8: memref<1x16xf32, #tpu.memory_space<vmem>>, %arg9: memref<16x16xbf16, #tpu.memory_space<vmem>>, %arg10: memref<16x16xbf16, #tpu.memory_space<vmem>>, %arg11: memref<1x16xf32, #tpu.memory_space<vmem>>, %arg12: memref<1x16xf32, #tpu.memory_space<vmem>>, %arg13: memref<2x1x3x256xf32, #tpu.memory_space<vmem>>) attributes {dimension_semantics = [#tpu.dimension_semantics<parallel>], iteration_bounds = array<i64: 2>, scalar_prefetch = 0 : i64, scratch_operands = 0 : i64, tpu.core_type = #tpu.core_type<tc>, window_params = [{pipeline_mode = #tpu.pipeline_mode<synchronous>, transform_indices = @transform_0, window_bounds = array<i64: 2, 8, 16, 4>}, {pipeline_mode = #tpu.pipeline_mode<synchronous>, transform_indices = @transform_1, window_bounds = array<i64: 8, 4>}, {pipeline_mode = #tpu.pipeline_mode<synchronous>, transform_indices = @transform_2, window_bounds = array<i64: 16, 4>}, {pipeline_mode = #tpu.pipeline_mode<synchronous>, transform_indices = @transform_3, window_bounds = array<i64: 48, 48>}, {pipeline_mode = #tpu.pipeline_mode<synchronous>, transform_indices = @transform_4, window_bounds = array<i64: 4, 16>}, {pipeline_mode = #tpu.pipeline_mode<synchronous>, transform_indices = @transform_5, window_bounds = array<i64: 4, 16>}, {pipeline_mode = #tpu.pipeline_mode<synchronous>, transform_indices = @transform_6, window_bounds = array<i64: 1, 16>}, {pipeline_mode = #tpu.pipeline_mode<synchronous>, transform_indices = @transform_7, window_bounds = array<i64: 1, 16>}, {pipeline_mode = #tpu.pipeline_mode<synchronous>, transform_indices = @transform_8, window_bounds = array<i64: 16, 16>}, {pipeline_mode = #tpu.pipeline_mode<synchronous>, transform_indices = @transform_9, window_bounds = array<i64: 16, 16>}, {pipeline_mode = #tpu.pipeline_mode<synchronous>, transform_indices = @transform_10, window_bounds = array<i64: 1, 16>}, {pipeline_mode = #tpu.pipeline_mode<synchronous>, transform_indices = @transform_11, window_bounds = array<i64: 1, 16>}, {transform_indices = @transform_12, window_bounds = array<i64: 2, 1, 3, 256>}]} {
    %c3_i32 = arith.constant 3 : i32
    %0 = arith.muli %arg0, %c3_i32 : i32
    %c0 = arith.constant 0 : index
    %1 = arith.index_cast %0 : i32 to index
    %c0_0 = arith.constant 0 : index
    %c0_1 = arith.constant 0 : index
    %2 = vector.load %arg1[%c0, %1, %c0_0, %c0_1] : memref<2x8x16x4xf32, #tpu.memory_space<vmem>>, vector<2x5x16x4xf32>
    %3 = arith.index_cast %0 : i32 to index
    %c0_2 = arith.constant 0 : index
    %4 = vector.load %arg2[%3, %c0_2] : memref<8x4xf32, #tpu.memory_space<vmem>>, vector<5x4xf32>
    %c0_3 = arith.constant 0 : index
    %c0_4 = arith.constant 0 : index
    %5 = vector.load %arg3[%c0_3, %c0_4] : memref<16x4xf32, #tpu.memory_space<vmem>>, vector<16x4xf32>
    %6 = vector.shape_cast %4 : vector<5x4xf32> to vector<1x5x1x4xf32>
    %7 = vector.broadcast %6 : vector<1x5x1x4xf32> to vector<2x5x16x4xf32>
    %8 = arith.addf %2, %7 : vector<2x5x16x4xf32>
    %9 = vector.shape_cast %5 : vector<16x4xf32> to vector<1x1x16x4xf32>
    %10 = vector.broadcast %9 : vector<1x1x16x4xf32> to vector<2x5x16x4xf32>
    %11 = arith.addf %8, %10 : vector<2x5x16x4xf32>
    %12 = vector.extract_strided_slice %11 {offsets = [0, 0, 0, 0], sizes = [2, 3, 16, 4], strides = [1, 1, 1, 1]} : vector<2x5x16x4xf32> to vector<2x3x16x4xf32>
    %13 = vector.shape_cast %12 : vector<2x3x16x4xf32> to vector<6x16x4xf32>
    %14 = vector.extract_strided_slice %11 {offsets = [0, 1, 0, 0], sizes = [2, 3, 16, 4], strides = [1, 1, 1, 1]} : vector<2x5x16x4xf32> to vector<2x3x16x4xf32>
    %15 = vector.shape_cast %14 : vector<2x3x16x4xf32> to vector<6x16x4xf32>
    %16 = vector.extract_strided_slice %11 {offsets = [0, 2, 0, 0], sizes = [2, 3, 16, 4], strides = [1, 1, 1, 1]} : vector<2x5x16x4xf32> to vector<2x3x16x4xf32>
    %17 = vector.shape_cast %16 : vector<2x3x16x4xf32> to vector<6x16x4xf32>
    %18 = tpu.concatenate %13, %15, %17 in 1 : vector<6x16x4xf32>, vector<6x16x4xf32>, vector<6x16x4xf32> -> vector<6x48x4xf32>
    %c0_5 = arith.constant 0 : index
    %c0_6 = arith.constant 0 : index
    %19 = vector.load %arg4[%c0_5, %c0_6] : memref<48x48xbf16, #tpu.memory_space<vmem>>, vector<48x48xbf16>
    %20 = vector.shape_cast %19 : vector<48x48xbf16> to vector<1x48x48xbf16>
    %21 = vector.broadcast %20 : vector<1x48x48xbf16> to vector<6x48x48xbf16>
    %22 = arith.truncf %18 : vector<6x48x4xf32> to vector<6x48x4xbf16>
    "tpu.trace_start"() <{level = 10 : i32, message = "mvw,mwc->mvc"}> : () -> ()
    %cst = arith.constant dense<0.000000e+00> : vector<6x48x4xf32>
    %23 = tpu.matmul %21, %22, %cst {dimension_numbers = #tpu.dot_dimension_numbers<[2], [1], [1], [2], [0, 0, 0, 1, 1, 2], [0], [0]>} : vector<6x48x48xbf16>, vector<6x48x4xbf16>, vector<6x48x4xf32> -> vector<6x48x4xf32>
    "tpu.trace_stop"() : () -> ()
    %24 = vector.shape_cast %23 : vector<6x48x4xf32> to vector<288x4xf32>
    %25 = arith.truncf %24 : vector<288x4xf32> to vector<288x4xbf16>
    %c0_7 = arith.constant 0 : index
    %c0_8 = arith.constant 0 : index
    %26 = vector.load %arg5[%c0_7, %c0_8] : memref<4x16xbf16, #tpu.memory_space<vmem>>, vector<4x16xbf16>
    %cst_9 = arith.constant dense<0.000000e+00> : vector<288x16xf32>
    %27 = tpu.matmul %25, %26, %cst_9 {dimension_numbers = #tpu.dot_dimension_numbers<[1], [0], [0], [1], [0, 0, 1, 1], [], []>} : vector<288x4xbf16>, vector<4x16xbf16>, vector<288x16xf32> -> vector<288x16xf32>
    %c0_10 = arith.constant 0 : index
    %c0_11 = arith.constant 0 : index
    %28 = vector.load %arg7[%c0_10, %c0_11] : memref<1x16xf32, #tpu.memory_space<vmem>>, vector<1x16xf32>
    %29 = vector.broadcast %28 : vector<1x16xf32> to vector<288x16xf32>
    %30 = arith.addf %27, %29 : vector<288x16xf32>
    %c0_12 = arith.constant 0 : index
    %c0_13 = arith.constant 0 : index
    %31 = vector.load %arg6[%c0_12, %c0_13] : memref<4x16xbf16, #tpu.memory_space<vmem>>, vector<4x16xbf16>
    %cst_14 = arith.constant dense<0.000000e+00> : vector<288x16xf32>
    %32 = tpu.matmul %25, %31, %cst_14 {dimension_numbers = #tpu.dot_dimension_numbers<[1], [0], [0], [1], [0, 0, 1, 1], [], []>} : vector<288x4xbf16>, vector<4x16xbf16>, vector<288x16xf32> -> vector<288x16xf32>
    %c0_15 = arith.constant 0 : index
    %c0_16 = arith.constant 0 : index
    %33 = vector.load %arg8[%c0_15, %c0_16] : memref<1x16xf32, #tpu.memory_space<vmem>>, vector<1x16xf32>
    %34 = vector.broadcast %33 : vector<1x16xf32> to vector<288x16xf32>
    %35 = arith.addf %32, %34 : vector<288x16xf32>
    %36 = arith.negf %35 : vector<288x16xf32>
    %37 = math.exp %36 : vector<288x16xf32>
    %cst_17 = arith.constant 1.000000e+00 : f32
    %38 = vector.broadcast %cst_17 : f32 to vector<288x16xf32>
    %39 = arith.addf %38, %37 : vector<288x16xf32>
    %40 = arith.divf %38, %39 : vector<288x16xf32>
    %41 = arith.mulf %30, %40 : vector<288x16xf32>
    %42 = vector.shape_cast %41 : vector<288x16xf32> to vector<6x48x16xf32>
    %43 = vector.extract_strided_slice %42 {offsets = [0, 16, 0], sizes = [6, 16, 16], strides = [1, 1, 1]} : vector<6x48x16xf32> to vector<6x16x16xf32>
    %44 = arith.truncf %42 : vector<6x48x16xf32> to vector<6x48x16xbf16>
    "tpu.trace_start"() <{level = 10 : i32, message = "mvw,mwc->mvc"}> : () -> ()
    %cst_18 = arith.constant dense<0.000000e+00> : vector<6x48x16xf32>
    %45 = tpu.matmul %21, %44, %cst_18 {dimension_numbers = #tpu.dot_dimension_numbers<[2], [1], [1], [2], [0, 0, 0, 1, 1, 2], [0], [0]>} : vector<6x48x48xbf16>, vector<6x48x16xbf16>, vector<6x48x16xf32> -> vector<6x48x16xf32>
    "tpu.trace_stop"() : () -> ()
    %46 = vector.shape_cast %45 : vector<6x48x16xf32> to vector<288x16xf32>
    %47 = arith.truncf %46 : vector<288x16xf32> to vector<288x16xbf16>
    %c0_19 = arith.constant 0 : index
    %c0_20 = arith.constant 0 : index
    %48 = vector.load %arg9[%c0_19, %c0_20] : memref<16x16xbf16, #tpu.memory_space<vmem>>, vector<16x16xbf16>
    %cst_21 = arith.constant dense<0.000000e+00> : vector<288x16xf32>
    %49 = tpu.matmul %47, %48, %cst_21 {dimension_numbers = #tpu.dot_dimension_numbers<[1], [0], [0], [1], [0, 0, 1, 1], [], []>} : vector<288x16xbf16>, vector<16x16xbf16>, vector<288x16xf32> -> vector<288x16xf32>
    %c0_22 = arith.constant 0 : index
    %c0_23 = arith.constant 0 : index
    %50 = vector.load %arg11[%c0_22, %c0_23] : memref<1x16xf32, #tpu.memory_space<vmem>>, vector<1x16xf32>
    %51 = vector.broadcast %50 : vector<1x16xf32> to vector<288x16xf32>
    %52 = arith.addf %49, %51 : vector<288x16xf32>
    %c0_24 = arith.constant 0 : index
    %c0_25 = arith.constant 0 : index
    %53 = vector.load %arg10[%c0_24, %c0_25] : memref<16x16xbf16, #tpu.memory_space<vmem>>, vector<16x16xbf16>
    %cst_26 = arith.constant dense<0.000000e+00> : vector<288x16xf32>
    %54 = tpu.matmul %47, %53, %cst_26 {dimension_numbers = #tpu.dot_dimension_numbers<[1], [0], [0], [1], [0, 0, 1, 1], [], []>} : vector<288x16xbf16>, vector<16x16xbf16>, vector<288x16xf32> -> vector<288x16xf32>
    %c0_27 = arith.constant 0 : index
    %c0_28 = arith.constant 0 : index
    %55 = vector.load %arg12[%c0_27, %c0_28] : memref<1x16xf32, #tpu.memory_space<vmem>>, vector<1x16xf32>
    %56 = vector.broadcast %55 : vector<1x16xf32> to vector<288x16xf32>
    %57 = arith.addf %54, %56 : vector<288x16xf32>
    %58 = arith.negf %57 : vector<288x16xf32>
    %59 = math.exp %58 : vector<288x16xf32>
    %cst_29 = arith.constant 1.000000e+00 : f32
    %60 = vector.broadcast %cst_29 : f32 to vector<288x16xf32>
    %61 = arith.addf %60, %59 : vector<288x16xf32>
    %62 = arith.divf %60, %61 : vector<288x16xf32>
    %63 = arith.mulf %52, %62 : vector<288x16xf32>
    %64 = vector.shape_cast %63 : vector<288x16xf32> to vector<6x48x16xf32>
    %65 = vector.extract_strided_slice %64 {offsets = [0, 16, 0], sizes = [6, 16, 16], strides = [1, 1, 1]} : vector<6x48x16xf32> to vector<6x16x16xf32>
    %66 = arith.maximumf %43, %65 : vector<6x16x16xf32>
    %67 = vector.shape_cast %66 : vector<6x16x16xf32> to vector<2x3x16x16xf32>
    %68 = vector.extract_strided_slice %67 {offsets = [0, 0, 0, 0], sizes = [2, 3, 1, 16], strides = [1, 1, 1, 1]} : vector<2x3x16x16xf32> to vector<2x3x1x16xf32>
    %69 = vector.shape_cast %68 : vector<2x3x1x16xf32> to vector<2x3x16xf32>
    %70 = vector.extract_strided_slice %67 {offsets = [0, 0, 1, 0], sizes = [2, 3, 1, 16], strides = [1, 1, 1, 1]} : vector<2x3x16x16xf32> to vector<2x3x1x16xf32>
    %71 = vector.shape_cast %70 : vector<2x3x1x16xf32> to vector<2x3x16xf32>
    %72 = vector.extract_strided_slice %67 {offsets = [0, 0, 2, 0], sizes = [2, 3, 1, 16], strides = [1, 1, 1, 1]} : vector<2x3x16x16xf32> to vector<2x3x1x16xf32>
    %73 = vector.shape_cast %72 : vector<2x3x1x16xf32> to vector<2x3x16xf32>
    %74 = vector.extract_strided_slice %67 {offsets = [0, 0, 3, 0], sizes = [2, 3, 1, 16], strides = [1, 1, 1, 1]} : vector<2x3x16x16xf32> to vector<2x3x1x16xf32>
    %75 = vector.shape_cast %74 : vector<2x3x1x16xf32> to vector<2x3x16xf32>
    %76 = vector.extract_strided_slice %67 {offsets = [0, 0, 4, 0], sizes = [2, 3, 1, 16], strides = [1, 1, 1, 1]} : vector<2x3x16x16xf32> to vector<2x3x1x16xf32>
    %77 = vector.shape_cast %76 : vector<2x3x1x16xf32> to vector<2x3x16xf32>
    %78 = vector.extract_strided_slice %67 {offsets = [0, 0, 5, 0], sizes = [2, 3, 1, 16], strides = [1, 1, 1, 1]} : vector<2x3x16x16xf32> to vector<2x3x1x16xf32>
    %79 = vector.shape_cast %78 : vector<2x3x1x16xf32> to vector<2x3x16xf32>
    %80 = vector.extract_strided_slice %67 {offsets = [0, 0, 6, 0], sizes = [2, 3, 1, 16], strides = [1, 1, 1, 1]} : vector<2x3x16x16xf32> to vector<2x3x1x16xf32>
    %81 = vector.shape_cast %80 : vector<2x3x1x16xf32> to vector<2x3x16xf32>
    %82 = vector.extract_strided_slice %67 {offsets = [0, 0, 7, 0], sizes = [2, 3, 1, 16], strides = [1, 1, 1, 1]} : vector<2x3x16x16xf32> to vector<2x3x1x16xf32>
    %83 = vector.shape_cast %82 : vector<2x3x1x16xf32> to vector<2x3x16xf32>
    %84 = vector.extract_strided_slice %67 {offsets = [0, 0, 8, 0], sizes = [2, 3, 1, 16], strides = [1, 1, 1, 1]} : vector<2x3x16x16xf32> to vector<2x3x1x16xf32>
    %85 = vector.shape_cast %84 : vector<2x3x1x16xf32> to vector<2x3x16xf32>
    %86 = vector.extract_strided_slice %67 {offsets = [0, 0, 9, 0], sizes = [2, 3, 1, 16], strides = [1, 1, 1, 1]} : vector<2x3x16x16xf32> to vector<2x3x1x16xf32>
    %87 = vector.shape_cast %86 : vector<2x3x1x16xf32> to vector<2x3x16xf32>
    %88 = vector.extract_strided_slice %67 {offsets = [0, 0, 10, 0], sizes = [2, 3, 1, 16], strides = [1, 1, 1, 1]} : vector<2x3x16x16xf32> to vector<2x3x1x16xf32>
    %89 = vector.shape_cast %88 : vector<2x3x1x16xf32> to vector<2x3x16xf32>
    %90 = vector.extract_strided_slice %67 {offsets = [0, 0, 11, 0], sizes = [2, 3, 1, 16], strides = [1, 1, 1, 1]} : vector<2x3x16x16xf32> to vector<2x3x1x16xf32>
    %91 = vector.shape_cast %90 : vector<2x3x1x16xf32> to vector<2x3x16xf32>
    %92 = vector.extract_strided_slice %67 {offsets = [0, 0, 12, 0], sizes = [2, 3, 1, 16], strides = [1, 1, 1, 1]} : vector<2x3x16x16xf32> to vector<2x3x1x16xf32>
    %93 = vector.shape_cast %92 : vector<2x3x1x16xf32> to vector<2x3x16xf32>
    %94 = vector.extract_strided_slice %67 {offsets = [0, 0, 13, 0], sizes = [2, 3, 1, 16], strides = [1, 1, 1, 1]} : vector<2x3x16x16xf32> to vector<2x3x1x16xf32>
    %95 = vector.shape_cast %94 : vector<2x3x1x16xf32> to vector<2x3x16xf32>
    %96 = vector.extract_strided_slice %67 {offsets = [0, 0, 14, 0], sizes = [2, 3, 1, 16], strides = [1, 1, 1, 1]} : vector<2x3x16x16xf32> to vector<2x3x1x16xf32>
    %97 = vector.shape_cast %96 : vector<2x3x1x16xf32> to vector<2x3x16xf32>
    %98 = vector.extract_strided_slice %67 {offsets = [0, 0, 15, 0], sizes = [2, 3, 1, 16], strides = [1, 1, 1, 1]} : vector<2x3x16x16xf32> to vector<2x3x1x16xf32>
    %99 = vector.shape_cast %98 : vector<2x3x1x16xf32> to vector<2x3x16xf32>
    %100 = tpu.concatenate %69, %71, %73, %75, %77, %79, %81, %83, %85, %87, %89, %91, %93, %95, %97, %99 in 2 : vector<2x3x16xf32>, vector<2x3x16xf32>, vector<2x3x16xf32>, vector<2x3x16xf32>, vector<2x3x16xf32>, vector<2x3x16xf32>, vector<2x3x16xf32>, vector<2x3x16xf32>, vector<2x3x16xf32>, vector<2x3x16xf32>, vector<2x3x16xf32>, vector<2x3x16xf32>, vector<2x3x16xf32>, vector<2x3x16xf32>, vector<2x3x16xf32>, vector<2x3x16xf32> -> vector<2x3x256xf32>
    %101 = vector.shape_cast %100 : vector<2x3x256xf32> to vector<2x1x3x256xf32>
    %c0_30 = arith.constant 0 : index
    %c0_31 = arith.constant 0 : index
    %c0_32 = arith.constant 0 : index
    %c0_33 = arith.constant 0 : index
    %102 = vector.load %arg13[%c0_30, %c0_31, %c0_32, %c0_33] : memref<2x1x3x256xf32, #tpu.memory_space<vmem>>, vector<2x1x3x256xf32>
    tpu.vector_store %arg13[%c0_30, %c0_31, %c0_32, %c0_33], %101 {strides = array<i32>} : memref<2x1x3x256xf32, #tpu.memory_space<vmem>>, vector<2x1x3x256xf32>,
    return
  }
  func.func @transform_0(%arg0: i32) -> (i32, i32, i32, i32) {
    %c0_i32 = arith.constant 0 : i32
    %c0_i32_0 = arith.constant 0 : i32
    %c0_i32_1 = arith.constant 0 : i32
    %c0_i32_2 = arith.constant 0 : i32
    %c0_i32_3 = arith.constant 0 : i32
    return %c0_i32, %c0_i32_0, %c0_i32_1, %c0_i32_2 : i32, i32, i32, i32
  }
  func.func @transform_1(%arg0: i32) -> (i32, i32) {
    %c0_i32 = arith.constant 0 : i32
    %c0_i32_0 = arith.constant 0 : i32
    %c0_i32_1 = arith.constant 0 : i32
    return %c0_i32, %c0_i32_0 : i32, i32
  }
  func.func @transform_2(%arg0: i32) -> (i32, i32) {
    %c0_i32 = arith.constant 0 : i32
    %c0_i32_0 = arith.constant 0 : i32
    %c0_i32_1 = arith.constant 0 : i32
    return %c0_i32, %c0_i32_0 : i32, i32
  }
  func.func @transform_3(%arg0: i32) -> (i32, i32) {
    %c0_i32 = arith.constant 0 : i32
    %c0_i32_0 = arith.constant 0 : i32
    %c0_i32_1 = arith.constant 0 : i32
    return %c0_i32, %c0_i32_0 : i32, i32
  }
  func.func @transform_4(%arg0: i32) -> (i32, i32) {
    %c0_i32 = arith.constant 0 : i32
    %c0_i32_0 = arith.constant 0 : i32
    %c0_i32_1 = arith.constant 0 : i32
    return %c0_i32, %c0_i32_0 : i32, i32
  }
  func.func @transform_5(%arg0: i32) -> (i32, i32) {
    %c0_i32 = arith.constant 0 : i32
    %c0_i32_0 = arith.constant 0 : i32
    %c0_i32_1 = arith.constant 0 : i32
    return %c0_i32, %c0_i32_0 : i32, i32
  }
  func.func @transform_6(%arg0: i32) -> (i32, i32) {
    %c0_i32 = arith.constant 0 : i32
    %c0_i32_0 = arith.constant 0 : i32
    %c0_i32_1 = arith.constant 0 : i32
    return %c0_i32, %c0_i32_0 : i32, i32
  }
  func.func @transform_7(%arg0: i32) -> (i32, i32) {
    %c0_i32 = arith.constant 0 : i32
    %c0_i32_0 = arith.constant 0 : i32
    %c0_i32_1 = arith.constant 0 : i32
    return %c0_i32, %c0_i32_0 : i32, i32
  }
  func.func @transform_8(%arg0: i32) -> (i32, i32) {
    %c0_i32 = arith.constant 0 : i32
    %c0_i32_0 = arith.constant 0 : i32
    %c0_i32_1 = arith.constant 0 : i32
    return %c0_i32, %c0_i32_0 : i32, i32
  }
  func.func @transform_9(%arg0: i32) -> (i32, i32) {
    %c0_i32 = arith.constant 0 : i32
    %c0_i32_0 = arith.constant 0 : i32
    %c0_i32_1 = arith.constant 0 : i32
    return %c0_i32, %c0_i32_0 : i32, i32
  }
  func.func @transform_10(%arg0: i32) -> (i32, i32) {
    %c0_i32 = arith.constant 0 : i32
    %c0_i32_0 = arith.constant 0 : i32
    %c0_i32_1 = arith.constant 0 : i32
    return %c0_i32, %c0_i32_0 : i32, i32
  }
  func.func @transform_11(%arg0: i32) -> (i32, i32) {
    %c0_i32 = arith.constant 0 : i32
    %c0_i32_0 = arith.constant 0 : i32
    %c0_i32_1 = arith.constant 0 : i32
    return %c0_i32, %c0_i32_0 : i32, i32
  }
  func.func @transform_12(%arg0: i32) -> (i32, i32, i32, i32) {
    %c0_i32 = arith.constant 0 : i32
    %c0_i32_0 = arith.constant 0 : i32
    %c0_i32_1 = arith.constant 0 : i32
    %c0_i32_2 = arith.constant 0 : i32
    return %c0_i32, %arg0, %c0_i32_0, %c0_i32_1 : i32, i32, i32, i32
  }
}

</mosaic_0001>

<bundles_post_ra>
// kernel: tpu_custom_call.1
= control target key start
LH: loop header
LB: loop body
LE: loop exit
PB: predicated region body
PF: predicated region fallthrough
CT: control target
= control target key end

     0   :  { %s3882_s21 = smov 0   ;;  %s3884_s22 = smov 0   ;;  %s4851_s0 = inlined_call_operand.vmem [shape: f32[2,8,16,4], index: 0, kind: input, shape index: {}]   ;;  %s4852_s1 = inlined_call_operand.vmem [shape: f32[8,4], index: 1, kind: input, shape index: {}]   ;;  %s4853_s2 = inlined_call_operand.vmem [shape: f32[16,4], index: 2, kind: input, shape index: {}]   ;;  %s4854_s3 = inlined_call_operand.vmem [shape: bf16[48,48], index: 3, kind: input, shape index: {}]   ;;  %s4855_s4 = inlined_call_operand.vmem [shape: bf16[4,16], index: 4, kind: input, shape index: {}]   ;;  %s4856_s5 = inlined_call_operand.vmem [shape: bf16[4,16], index: 5, kind: input, shape index: {}]   ;;  %s4857_s6 = inlined_call_operand.vmem [shape: f32[1,16], index: 6, kind: input, shape index: {}]   ;;  %s4858_s7 = inlined_call_operand.vmem [shape: f32[1,16], index: 7, kind: input, shape index: {}]   ;;  %s4859_s8 = inlined_call_operand.vmem [shape: bf16[16,16], index: 8, kind: input, shape index: {}]   ;;  %s4860_s9 = inlined_call_operand.vmem [shape: bf16[16,16], index: 9, kind: input, shape index: {}]   ;;  %s4861_s10 = inlined_call_operand.vmem [shape: f32[1,16], index: 10, kind: input, shape index: {}]   ;;  %s4862_s11 = inlined_call_operand.vmem [shape: f32[1,16], index: 11, kind: input, shape index: {}]   ;;  %s4863_s12 = inlined_call_operand.vmem [shape: f32[2,2,3,256], index: 12, kind: output, shape index: {}]  }
   0x1   :  { %s3886_s23 = smov 0  }
   0x2 LB: > { %s3895_s24 = sadd.s32 4294967295, %s3805_s23   ;;  %s3897_s25 = sadd.s32 1, %s3805_s23   ;;  %s3805_s23 = sphi %s3886_s23, %s4867_s23   ;;  %s3801_s22 = sphi %s3884_s22, %s4866_s22   ;;  %s3797_s21 = sphi %s3882_s21, %s4865_s21  }
   0x3   : > { %s278_s26 = ssub.s32 %s3805_s23, %s3897_s25  ;;  %s281_s27 = sadd.s32 1, %s3801_s22 }
   0x4   : > { %p279_p0 = scmp.eq.s32.totalorder %s278_s26, 0  ;;  %p291_p1 = scmp.ne.s32.totalorder %s3801_s22, %s3797_s21 }
   0x5   : > { %p292_p2 = scmp.eq.s32.totalorder %s3895_s24, 1  ;;  %p2856_p3 = scmp.ge.s32.totalorder %s3805_s23, 1 }
   0x6   : > { %s3905_s28 = scalar_select %p279_p0, %s3801_s22, %s281_s27  }
   0x7   : > { %p3907_p4 = por %p292_p2, %p291_p1  ;;  %p352_p5 = scmp.lt.s32.totalorder %s3805_s23, 3 }
   0x9   : > { %p353_p6 = pnand %p2856_p3, %p352_p5 }
   0xa   : > { %s389_s30 = smul.u32 (!%p353_p6), 3, %s3895_s24  ;;  %s3811_s17 = smov (!%p353_p6), 16  }
   0xb   : > { %356 = sbr.rel (%p353_p6) target bundleno = 1194 (0x4aa), region = 68  ;;  %s3812_s18 = smov (!%p353_p6), 48  }
   0xc   : > { %s2858_s13 = smul.u32 (!%p353_p6), 48, %s3895_s24  ;;  %s412_s16 = scalar_lea.vmem (!%p353_p6), %s4852_s1, %s389_s30 }
   0xd   : > { %s3814_s20 = smov (!%p353_p6), 80   ;;  %s3815_s23 = smov (!%p353_p6), 96  }
   0xe   : > { %s3925_s19 = scalar_lea.vmem (!%p353_p6), %s4851_s0, %s2858_s13  ;;  %s3816_s26 = smov (!%p353_p6), 112  }
   0xf   : > { %s385_s27 = sand.u32 (!%p353_p6), 1, %s3797_s21  }
  0x10   : > { %v421_v0 = vlaneseq  ;;  %v3807_v1 = vmov 0.0   ;;  %v3808_v2 = vmov 1966171168   ;;  %vm3809_vm0 = vmmov 0   ;;  %v413_v5 = vld [vmem:[%s412_s16] sm:$0x1f] }
  0x11   : > { %3178 = vmatprep.subr.bf16.mxu0 %v3807_v1  ;;  %v419_v3 = vunpack.c.l.s4 %v3808_v2  ;;  %3196 = vmatprep.subr.bf16.mxu1 %v3807_v1  ;;  %v417_v7 = vcombine.high %v413_v5, %v413_v5  ;;  %v396_v14 = vld [vmem:[%s3925_s19 + $0x20] sm:$0xff]  ;;  %v397_v15 = vld [vmem:[%s3925_s19 + $0x28] sm:$0xff]  ;;  %v394_v17 = vld [vmem:[%s3925_s19 + $0x10] sm:$0xff]  ;;  %vm552_vm1 = vcmask 392192   ;;  %vm985_vm2 = vcmask 1041408   ;;  %s3810_s16 = smov 32  }
  0x12   : > { %v422_v4 = vshrl.u32 %v421_v0, 7  ;;  %3184 = vmatprep.mubr.msk.bf16.mxu0 %vm3809_vm0, %v3807_v1  ;;  %3202 = vmatprep.mubr.msk.bf16.mxu1 %vm3809_vm0, %v3807_v1  ;;  %v395_v19 = vld [vmem:[%s3925_s19 + $0x18] sm:$0xff]  ;;  %v392_v25 = vld [vmem:[%s3925_s19] sm:$0xff]  ;;  %v393_v26 = vld [vmem:[%s3925_s19 + $0x8] sm:$0xff]  ;;  %vm930_vm3 = vcmask 31744   ;;  %vm1999_vm4 = vcmask 130048  }
  0x13   : > { %v420_v6 = vunpack.c.0.s8 %v419_v3  ;;  %v3938_v27 = vld [vmem:[%s4853_s2] sm:$0xff]  ;;  %v3943_v28 = vld [vmem:[%s4853_s2 + $0x8] sm:$0xff]  ;;  %v398_v33 = vld [vmem:[%s3925_s19 + $0x30] sm:$0xff]  ;;  %vm2481_vm5 = vcmask 1042434   ;;  %vm2478_vm6 = vcmask 1041409   ;;  %vm2723_vm7 = vcmask 261120  }
  0x14   : > { %v458_v12 = vsub.s32 0, %v422_v4  ;;  %v399_v34 = vld [vmem:[%s3925_s19 + $0x38] sm:$0xff]  ;;  %v400_v43 = vld [vmem:[%s3925_s19 + $0x40] sm:$0xff]  ;;  %v401_v46 = vld [vmem:[%s3925_s19 + $0x48] sm:$0xff]  ;;  %vm2728_vm8 = vcmask 523264   ;;  %vm2731_vm9 = vcmask 654336  }
  0x15   : > { %v423_v8 = vsub.s32 %v420_v6, %v422_v4  ;;  %v406_v55 = vld [vmem:[%s3925_s19 + $0xa0] sm:$0xff]  ;;  %v407_v56 = vld [vmem:[%s3925_s19 + $0xa8] sm:$0xff]  ;;  %v404_v63 = vld [vmem:[%s3925_s19 + $0x90] sm:$0xff]  ;;  %vm2734_vm10 = vcmask 785408   ;;  %vm2737_vm11 = vcmask 916480   ;;  %s2857_s30 = sshll.u32 %s385_s27, 4 }
  0x16   : > { %v405_v0 = vld [vmem:[%s3925_s19 + $0x98] sm:$0xff]  ;;  %v3979_v2 = vld [vmem:[%s4854_s3] sm:$0xff]   ;;  %s387_s21 = scalar_lea.vmem [#allocation2], %s2857_s30  ;;  %s3029_s13 = sshll.u32 (%p3907_p4), %s3895_s24, 3 }
  0x17   : > { %v424_v9 = vrot.slane %v413_v5, %v423_v8  ;;  %v431_v10 = vrot.slane %v417_v7, %v423_v8  ;;  %v402_v7 = vld [vmem:[%s3925_s19 + $0x80] sm:$0xff] }
  0x19   : > { %v439_v11 = vrot.slane %v424_v9, %v423_v8  ;;  %v432_v13 = vcombine.high %v424_v9, %v424_v9  ;;  %v446_v21 = vrot.slane %v431_v10, %v423_v8 }
  0x1b   : > { %v454_v16 = vcombine.high %v439_v11, %v439_v11  ;;  %v453_v18 = vrot.slane %v432_v13, %v423_v8  ;;  %v3931_v20 = vrot.slane %v439_v11, %v458_v12  ;;  %v3951_v38 = vrot.slane %v446_v21, %v458_v12  ;;  %v403_v8 = vld [vmem:[%s3925_s19 + $0x88] sm:$0xff]  ;;  %v409_v21 = vld [vmem:[%s3925_s19 + $0xb8] sm:$0xff] }
  0x1d   : > { %v467_v22 = vrot.slane %v454_v16, %v458_v12  ;;  %v463_v23 = vrot.slane %v453_v18, %v458_v12  ;;  %v455_v24 = vcombine.high %v453_v18, %v453_v18  ;;  %v481_v36 = vadd.f32 %v3931_v20, %v392_v25  ;;  %v410_v25 = vld [vmem:[%s3925_s19 + $0xc0] sm:$0xff] }
  0x1e   : > { %v482_v37 = vadd.f32 %v3931_v20, %v393_v26  ;;  %v489_v50 = vadd.f32 %v3951_v38, %v400_v43  ;;  %v490_v54 = vadd.f32 %v3951_v38, %v401_v46  ;;  %v491_v10 = vadd.f32 %v3931_v20, %v402_v7  ;;  %v411_v26 = vld [vmem:[%s3925_s19 + $0xc8] sm:$0xff] }
  0x1f   : > { %v485_v29 = vadd.f32 %v467_v22, %v396_v14  ;;  %v486_v30 = vadd.f32 %v467_v22, %v397_v15  ;;  %v483_v31 = vadd.f32 %v463_v23, %v394_v17  ;;  %v484_v32 = vadd.f32 %v463_v23, %v395_v19  ;;  %v4004_v15 = vld [vmem:[%s4854_s3 + $0x8] sm:$0xff]  }
  0x20   : > { %v3947_v35 = vrot.slane %v455_v24, %v458_v12  ;;  %v501_v52 = vadd.f32 %v481_v36, %v3938_v27  ;;  %v502_v53 = vadd.f32 %v482_v37, %v3943_v28  ;;  %v495_v58 = vadd.f32 %v467_v22, %v406_v55 }
  0x21   : > { %v505_v39 = vadd.f32 %v485_v29, %v3938_v27  ;;  %v506_v40 = vadd.f32 %v486_v30, %v3943_v28  ;;  %v503_v41 = vadd.f32 %v483_v31, %v3938_v27  ;;  %v504_v42 = vadd.f32 %v484_v32, %v3943_v28 }
  0x22   : > { %v487_v44 = vadd.f32 %v3947_v35, %v398_v33  ;;  %v488_v45 = vadd.f32 %v3947_v35, %v399_v34  ;;  %v496_v59 = vadd.f32 %v467_v22, %v407_v56  ;;  %v527_v60 = vpack.c.bf16 %v502_v53, %v501_v52  ;;  %v3585_v22 = vld [vmem:[%s4854_s3 + $0x10] sm:$0xff]  }
  0x23   : > { %v529_v47 = vpack.c.bf16 %v506_v40, %v505_v39  ;;  %v528_v51 = vpack.c.bf16 %v504_v42, %v503_v41  ;;  %v509_v61 = vadd.f32 %v489_v50, %v3938_v27  ;;  %v510_v62 = vadd.f32 %v490_v54, %v3943_v28 }
  0x24   : > { %v507_v48 = vadd.f32 %v487_v44, %v3938_v27  ;;  %v508_v49 = vadd.f32 %v488_v45, %v3943_v28  ;;  %v515_v3 = vadd.f32 %v495_v58, %v3938_v27  ;;  %v516_v4 = vadd.f32 %v496_v59, %v3943_v28 }
  0x25   : > { %3179 = vmatpush3.bf16.msra.mxu0 %v529_v47  ;;  %v493_v5 = vadd.f32 %v463_v23, %v404_v63  ;;  %v494_v6 = vadd.f32 %v463_v23, %v405_v0  ;;  %v531_v9 = vpack.c.bf16 %v510_v62, %v509_v61  ;;  %v492_v11 = vadd.f32 %v3931_v20, %v403_v8  ;;  %v408_v20 = vld [vmem:[%s3925_s19 + $0xb0] sm:$0xff]  ;;  %s3813_s19 = smov 64  }
  0x26   : > { %3180 = vmatprep.subr.bf16.mxu0 %v3807_v1  ;;  %v530_v57 = vpack.c.bf16 %v508_v49, %v507_v48  ;;  %v3991_v12 = vpack.c.bf16 %v516_v4, %v515_v3  ;;  %v511_v17 = vadd.f32 %v491_v10, %v3938_v27  ;;  %v497_v23 = vadd.f32 %v3947_v35, %v408_v20 }
  0x27   : > { %v513_v13 = vadd.f32 %v493_v5, %v3938_v27  ;;  %v514_v14 = vadd.f32 %v494_v6, %v3943_v28  ;;  %v512_v18 = vadd.f32 %v492_v11, %v3943_v28  ;;  %v498_v24 = vadd.f32 %v3947_v35, %v409_v21 }
  0x28   : > { %3197 = vmatpush3.bf16.msra.mxu1 %v530_v57  ;;  %v499_v29 = vadd.f32 %v3951_v38, %v410_v25  ;;  %v500_v30 = vadd.f32 %v3951_v38, %v411_v26  ;;  %v517_v31 = vadd.f32 %v497_v23, %v3938_v27 }
  0x29   : > { %3181 = vmatpush3.bf16.msra.mxu0 %v528_v51  ;;  %3198 = vmatprep.subr.bf16.mxu1 %v3807_v1  ;;  %v533_v16 = vpack.c.bf16 %v514_v14, %v513_v13  ;;  %v532_v19 = vpack.c.bf16 %v512_v18, %v511_v17  ;;  %v518_v32 = vadd.f32 %v498_v24, %v3943_v28 }
  0x2a   : > { %3182 = vmatprep.subr.bf16.mxu0 %v3807_v1  ;;  %v519_v33 = vadd.f32 %v499_v29, %v3938_v27  ;;  %v520_v34 = vadd.f32 %v500_v30, %v3943_v28  ;;  %v922_v27 = vld [vmem:[%s4855_s4] sm:$0x3] }
  0x2b   : > { %v535_v35 = vpack.c.bf16 %v518_v32, %v517_v31  ;;  %v1166_v28 = vld [vmem:[%s4856_s5] sm:$0x3]  ;;  %v987_v37 = vsel %vm985_vm2, %v922_v27, 0 }
  0x2c   : > { %3199 = vmatpush3.bf16.msra.mxu1 %v529_v47  ;;  %v536_v36 = vpack.c.bf16 %v520_v34, %v519_v33  ;;  %v1175_v38 = vsel %vm985_vm2, %v1166_v28, 0 }
  0x2d   : > { %3183 = vmatpush3.bf16.msra.mxu0 %v527_v60  ;;  %3200 = vmatprep.subr.bf16.mxu1 %v3807_v1 }
  0x2e   : > { %3214 = vmatprep.subr.bf16.mxu0 %v3807_v1 }
  0x30   : > { %3185 = vmatmul.mubr.msk.bf16.vlgmr.msra.gmra.mxu0 %vm552_vm1, %v3979_v2  ;;  %3201 = vmatpush3.bf16.msra.mxu1 %v528_v51 }
  0x31   : > { %3188 = vmatprep.mubr.msk.bf16.mxu0 %vm3809_vm0, %v3807_v1  ;;  %3215 = vmatpush3.bf16.msra.mxu0 %v531_v9 }
  0x32   : > { %3216 = vmatprep.subr.bf16.mxu0 %v3807_v1  ;;  %3232 = vmatprep.subr.bf16.mxu1 %v3807_v1 }
  0x33   : > { %3203 = vmatmul.mubr.msk.bf16.vlgmr.msra.gmra.mxu1 %vm552_vm1, %v3979_v2 }
  0x34   : > { %3206 = vmatprep.mubr.msk.bf16.mxu1 %vm3809_vm0, %v3807_v1  ;;  %3233 = vmatpush3.bf16.msra.mxu1 %v3991_v12 }
  0x35   : > { %3217 = vmatpush3.bf16.msra.mxu0 %v530_v57  ;;  %3234 = vmatprep.subr.bf16.mxu1 %v3807_v1 }
  0x36   : > { %3218 = vmatprep.subr.bf16.mxu0 %v3807_v1 }
  0x38   : > { %3189 = vmatmul.mubr.msk.bf16.gmra.mxu0 %vm552_vm1, %v4004_v15  ;;  %3235 = vmatpush3.bf16.msra.mxu1 %v533_v16 }
  0x39   : > { %3192 = vmatprep.mubr.msk.bf16.mxu0 %vm3809_vm0, %v3807_v1  ;;  %3219 = vmatpush3.bf16.msra.mxu0 %v529_v47 }
  0x3a   : > { %3236 = vmatprep.subr.bf16.mxu1 %v3807_v1  ;;  %3250 = vmatprep.subr.bf16.mxu0 %v3807_v1 }
  0x3b   : > { %3207 = vmatmul.mubr.msk.bf16.gmra.mxu1 %vm552_vm1, %v4004_v15 }
  0x3c   : > { %3210 = vmatprep.mubr.msk.bf16.mxu1 %vm3809_vm0, %v3807_v1  ;;  %3237 = vmatpush3.bf16.msra.mxu1 %v532_v19 }
  0x3d   : > { %3268 = vmatprep.subr.bf16.mxu1 %v3807_v1 }
  0x40   : > { %3193 = vmatmul.mubr.msk.bf16.gmra.mxu0 %vm552_vm1, %v3585_v22 }
  0x41   : > { %3220 = vmatprep.mubr.msk.bf16.mxu0 %vm3809_vm0, %v3807_v1 }
  0x43   : > { %3211 = vmatmul.mubr.msk.bf16.gmra.mxu1 %vm552_vm1, %v3585_v22 }
  0x44   : > { %3238 = vmatprep.mubr.msk.bf16.mxu1 %vm3809_vm0, %v3807_v1 }
  0x48   : > { %3221 = vmatmul.mubr.msk.bf16.vlgmr.msra.gmra.mxu0 %vm552_vm1, %v3979_v2 }
  0x49   : > { %3224 = vmatprep.mubr.msk.bf16.mxu0 %vm3809_vm0, %v3807_v1  ;;  %3251 = vmatpush3.bf16.msra.mxu0 %v535_v35 }
  0x4a   : > { %3252 = vmatprep.subr.bf16.mxu0 %v3807_v1 }
  0x4b   : > { %3239 = vmatmul.mubr.msk.bf16.vlgmr.msra.gmra.mxu1 %vm552_vm1, %v3979_v2 }
  0x4c   : > { %3242 = vmatprep.mubr.msk.bf16.mxu1 %vm3809_vm0, %v3807_v1  ;;  %3269 = vmatpush3.bf16.msra.mxu1 %v536_v36 }
  0x4d   : > { %3253 = vmatpush3.bf16.msra.mxu0 %v3991_v12  ;;  %3270 = vmatprep.subr.bf16.mxu1 %v3807_v1 }
  0x4e   : > { %3254 = vmatprep.subr.bf16.mxu0 %v3807_v1 }
  0x50   : > { %3225 = vmatmul.mubr.msk.bf16.gmra.mxu0 %vm552_vm1, %v4004_v15  ;;  %3271 = vmatpush3.bf16.msra.mxu1 %v535_v35 }
  0x51   : > { %3228 = vmatprep.mubr.msk.bf16.mxu0 %vm3809_vm0, %v3807_v1  ;;  %3255 = vmatpush3.bf16.msra.mxu0 %v533_v16 }
  0x52   : > { %3272 = vmatprep.subr.bf16.mxu1 %v3807_v1  ;;  %3546 = vmatprep.subr.msk.bf16.mxu0 %vm985_vm2, %v922_v27 }
  0x53   : > { %3243 = vmatmul.mubr.msk.bf16.gmra.mxu1 %vm552_vm1, %v4004_v15 }
  0x54   : > { %3246 = vmatprep.mubr.msk.bf16.mxu1 %vm3809_vm0, %v3807_v1  ;;  %3273 = vmatpush3.bf16.msra.mxu1 %v3991_v12 }
  0x55   : > { %3547 = vmatprep.subr.msk.bf16.mxu1 %vm985_vm2, %v1166_v28 }
  0x58   : > { %3229 = vmatmul.mubr.msk.bf16.gmra.mxu0 %vm552_vm1, %v3585_v22 }
  0x59   : > { %3256 = vmatprep.mubr.msk.bf16.mxu0 %vm3809_vm0, %v3807_v1 }
  0x5b   : > { %3247 = vmatmul.mubr.msk.bf16.gmra.mxu1 %vm552_vm1, %v3585_v22 }
  0x5c   : > { %3274 = vmatprep.mubr.msk.bf16.mxu1 %vm3809_vm0, %v3807_v1 }
  0x60   : > { %3257 = vmatmul.mubr.msk.bf16.vlgmr.msra.gmra.mxu0 %vm552_vm1, %v3979_v2 }
  0x61   : > { %3260 = vmatprep.mubr.msk.bf16.mxu0 %vm3809_vm0, %v3807_v1  ;;  %3287 = vmatpush3.bf16.msra.mxu0 %v987_v37 }
  0x62   : > { %3362 = vmatprep.subr.bf16.mxu0 %v3807_v1 }
  0x63   : > { %3275 = vmatmul.mubr.msk.bf16.vlgmr.msra.gmra.mxu1 %vm552_vm1, %v3979_v2 }
  0x64   : > { %3278 = vmatprep.mubr.msk.bf16.mxu1 %vm3809_vm0, %v3807_v1  ;;  %3325 = vmatpush3.bf16.msra.mxu1 %v1175_v38 }
  0x65   : > { %3380 = vmatprep.subr.bf16.mxu1 %v3807_v1 }
  0x68   : > { %3261 = vmatmul.mubr.msk.bf16.gmra.mxu0 %vm552_vm1, %v4004_v15 }
  0x69   : > { %3264 = vmatprep.mubr.msk.bf16.mxu0 %vm3809_vm0, %v3807_v1 }
  0x6b   : > { %3279 = vmatmul.mubr.msk.bf16.gmra.mxu1 %vm552_vm1, %v4004_v15 }
  0x6c   : > { %3282 = vmatprep.mubr.msk.bf16.mxu1 %vm3809_vm0, %v3807_v1 }
  0x70   : > { %3265 = vmatmul.mubr.msk.bf16.gmra.mxu0 %vm552_vm1, %v3585_v22 }
  0x73   : > { %3283 = vmatmul.mubr.msk.bf16.gmra.mxu1 %vm552_vm1, %v3585_v22 }
  0xf0   : > { %v596_v39 = vpop.f32.mrf.mxu0 }
  0xf2   : > { %v3186_v40 = vpop.f32.mrf.mxu0 }
  0xf3   : > { %v653_v41 = vpop.f32.mrf.mxu1 }
  0xf4   : > { %v599_v42 = vpop.f32.mrf.mxu0 }
  0xf5   : > { %v904_v43 = vpack.c.bf16 %v599_v42, %v596_v39  ;;  %v3204_v44 = vpop.f32.mrf.mxu1 }
  0xf6   : > { %v3187_v45 = vpop.f32.mrf.mxu0 }
  0xf7   : > { %3288 = vmatprep.mubr.msk.bf16.mxu0 %vm930_vm3, %v904_v43  ;;  %3326 = vmatprep.mubr.msk.bf16.mxu1 %vm930_vm3, %v904_v43  ;;  %v656_v46 = vpop.f32.mrf.mxu1 }
  0xf8   : > { %v604_v47 = vpop.f32.mrf.mxu0  ;;  %v907_v63 = vpack.c.bf16 %v656_v46, %v653_v41 }
  0xf9   : > { %v3205_v48 = vpop.f32.mrf.mxu1 }
  0xfa   : > { %v3190_v49 = vpop.f32.mrf.mxu0 }
  0xfb   : > { %v661_v50 = vpop.f32.mrf.mxu1 }
  0xfc   : > { %v607_v51 = vpop.f32.mrf.mxu0 }
  0xfd   : > { %v905_v52 = vpack.c.bf16 %v607_v51, %v604_v47  ;;  %v3208_v53 = vpop.f32.mrf.mxu1 }
  0xfe   : > { %v3191_v54 = vpop.f32.mrf.mxu0 }
  0xff   : > { %3289 = vmatmul.mubr.msk.bf16.vlgmr.msra.gmra.mxu0 %vm930_vm3, %v905_v52  ;;  %3327 = vmatmul.mubr.msk.bf16.vlgmr.msra.gmra.mxu1 %vm930_vm3, %v905_v52  ;;  %v664_v55 = vpop.f32.mrf.mxu1 }
 0x100   : > { %v612_v56 = vpop.f32.mrf.mxu0  ;;  %v908_v3 = vpack.c.bf16 %v664_v55, %v661_v50 }
 0x101   : > { %v3209_v57 = vpop.f32.mrf.mxu1 }
 0x102   : > { %v3194_v58 = vpop.f32.mrf.mxu0 }
 0x103   : > { %v669_v59 = vpop.f32.mrf.mxu1 }
 0x104   : > { %v615_v60 = vpop.f32.mrf.mxu0 }
 0x105   : > { %v906_v61 = vpack.c.bf16 %v615_v60, %v612_v56  ;;  %v3212_v62 = vpop.f32.mrf.mxu1 }
 0x106   : > { %v3195_v0 = vpop.f32.mrf.mxu0 }
 0x107   : > { %3292 = vmatprep.mubr.msk.bf16.mxu0 %vm930_vm3, %v906_v61  ;;  %3330 = vmatprep.mubr.msk.bf16.mxu1 %vm930_vm3, %v906_v61  ;;  %v672_v4 = vpop.f32.mrf.mxu1 }
 0x108   : > { %v710_v5 = vpop.f32.mrf.mxu0  ;;  %3293 = vmatmul.mubr.msk.bf16.gmra.mxu0 %vm930_vm3, %v907_v63  ;;  %3331 = vmatmul.mubr.msk.bf16.gmra.mxu1 %vm930_vm3, %v907_v63  ;;  %v909_v11 = vpack.c.bf16 %v672_v4, %v669_v59 }
 0x109   : > { %3296 = vmatprep.mubr.msk.bf16.mxu0 %vm930_vm3, %v908_v3  ;;  %3334 = vmatprep.mubr.msk.bf16.mxu1 %vm930_vm3, %v908_v3  ;;  %v3213_v6 = vpop.f32.mrf.mxu1 }
 0x10a   : > { %v3222_v7 = vpop.f32.mrf.mxu0 }
 0x10b   : > { %v767_v8 = vpop.f32.mrf.mxu1 }
 0x10c   : > { %v713_v9 = vpop.f32.mrf.mxu0 }
 0x10d   : > { %v3240_v10 = vpop.f32.mrf.mxu1  ;;  %v910_v13 = vpack.c.bf16 %v713_v9, %v710_v5  ;;  %v4142_v5 = vld [vmem:[%s4858_s7] ss:$0 sm:$0xff] }
 0x10e   : > { %v3223_v12 = vpop.f32.mrf.mxu0 }
 0x10f   : > { %v770_v14 = vpop.f32.mrf.mxu1 }
 0x110   : > { %v718_v15 = vpop.f32.mrf.mxu0  ;;  %3297 = vmatmul.mubr.msk.bf16.gmra.mxu0 %vm930_vm3, %v909_v11  ;;  %3335 = vmatmul.mubr.msk.bf16.gmra.mxu1 %vm930_vm3, %v909_v11  ;;  %v913_v33 = vpack.c.bf16 %v770_v14, %v767_v8 }
 0x111   : > { %v3241_v16 = vpop.f32.mrf.mxu1  ;;  %3338 = vmatprep.mubr.msk.bf16.mxu1 %vm930_vm3, %v910_v13  ;;  %3300 = vmatprep.mubr.msk.bf16.mxu0 %vm930_vm3, %v910_v13 }
 0x112   : > { %v3226_v17 = vpop.f32.mrf.mxu0 }
 0x113   : > { %v775_v18 = vpop.f32.mrf.mxu1 }
 0x114   : > { %v721_v19 = vpop.f32.mrf.mxu0 }
 0x115   : > { %v911_v20 = vpack.c.bf16 %v721_v19, %v718_v15  ;;  %v3244_v21 = vpop.f32.mrf.mxu1 }
 0x116   : > { %v3227_v22 = vpop.f32.mrf.mxu0 }
 0x117   : > { %v778_v23 = vpop.f32.mrf.mxu1 }
 0x118   : > { %v726_v24 = vpop.f32.mrf.mxu0  ;;  %3339 = vmatmul.mubr.msk.bf16.gmra.mxu1 %vm930_vm3, %v911_v20  ;;  %3301 = vmatmul.mubr.msk.bf16.gmra.mxu0 %vm930_vm3, %v911_v20  ;;  %v914_v35 = vpack.c.bf16 %v778_v23, %v775_v18 }
 0x119   : > { %v3245_v25 = vpop.f32.mrf.mxu1 }
 0x11a   : > { %v3230_v26 = vpop.f32.mrf.mxu0 }
 0x11b   : > { %v783_v29 = vpop.f32.mrf.mxu1 }
 0x11c   : > { %v729_v30 = vpop.f32.mrf.mxu0 }
 0x11d   : > { %v912_v31 = vpack.c.bf16 %v729_v30, %v726_v24  ;;  %v3248_v32 = vpop.f32.mrf.mxu1 }
 0x11e   : > { %v3231_v34 = vpop.f32.mrf.mxu0 }
 0x11f   : > { %3342 = vmatprep.mubr.msk.bf16.mxu1 %vm930_vm3, %v912_v31  ;;  %v786_v36 = vpop.f32.mrf.mxu1  ;;  %3304 = vmatprep.mubr.msk.bf16.mxu0 %vm930_vm3, %v912_v31 }
 0x120   : > { %v824_v27 = vpop.f32.mrf.mxu0  ;;  %3343 = vmatmul.mubr.msk.bf16.gmra.mxu1 %vm930_vm3, %v913_v33  ;;  %3305 = vmatmul.mubr.msk.bf16.gmra.mxu0 %vm930_vm3, %v913_v33  ;;  %v915_v41 = vpack.c.bf16 %v786_v36, %v783_v29 }
 0x121   : > { %v3249_v28 = vpop.f32.mrf.mxu1  ;;  %3346 = vmatprep.mubr.msk.bf16.mxu1 %vm930_vm3, %v914_v35  ;;  %3308 = vmatprep.mubr.msk.bf16.mxu0 %vm930_vm3, %v914_v35 }
 0x122   : > { %v3258_v37 = vpop.f32.mrf.mxu0 }
 0x123   : > { %v881_v38 = vpop.f32.mrf.mxu1 }
 0x124   : > { %v827_v39 = vpop.f32.mrf.mxu0 }
 0x125   : > { %v3276_v40 = vpop.f32.mrf.mxu1  ;;  %v916_v43 = vpack.c.bf16 %v827_v39, %v824_v27 }
 0x126   : > { %v3259_v42 = vpop.f32.mrf.mxu0 }
 0x127   : > { %v884_v44 = vpop.f32.mrf.mxu1 }
 0x128   : > { %v832_v45 = vpop.f32.mrf.mxu0  ;;  %3347 = vmatmul.mubr.msk.bf16.gmra.mxu1 %vm930_vm3, %v915_v41  ;;  %3309 = vmatmul.mubr.msk.bf16.gmra.mxu0 %vm930_vm3, %v915_v41  ;;  %v919_v61 = vpack.c.bf16 %v884_v44, %v881_v38 }
 0x129   : > { %v3277_v46 = vpop.f32.mrf.mxu1  ;;  %3350 = vmatprep.mubr.msk.bf16.mxu1 %vm930_vm3, %v916_v43  ;;  %3312 = vmatprep.mubr.msk.bf16.mxu0 %vm930_vm3, %v916_v43 }
 0x12a   : > { %v3262_v47 = vpop.f32.mrf.mxu0 }
 0x12b   : > { %v889_v48 = vpop.f32.mrf.mxu1 }
 0x12c   : > { %v835_v49 = vpop.f32.mrf.mxu0 }
 0x12d   : > { %v917_v50 = vpack.c.bf16 %v835_v49, %v832_v45  ;;  %v3280_v51 = vpop.f32.mrf.mxu1 }
 0x12e   : > { %v3263_v52 = vpop.f32.mrf.mxu0 }
 0x12f   : > { %v892_v53 = vpop.f32.mrf.mxu1 }
 0x130   : > { %v840_v54 = vpop.f32.mrf.mxu0  ;;  %3351 = vmatmul.mubr.msk.bf16.gmra.mxu1 %vm930_vm3, %v917_v50  ;;  %3313 = vmatmul.mubr.msk.bf16.gmra.mxu0 %vm930_vm3, %v917_v50  ;;  %v920_v63 = vpack.c.bf16 %v892_v53, %v889_v48 }
 0x131   : > { %v3281_v55 = vpop.f32.mrf.mxu1 }
 0x132   : > { %v3266_v56 = vpop.f32.mrf.mxu0 }
 0x133   : > { %v897_v57 = vpop.f32.mrf.mxu1 }
 0x134   : > { %v843_v58 = vpop.f32.mrf.mxu0 }
 0x135   : > { %v918_v59 = vpack.c.bf16 %v843_v58, %v840_v54  ;;  %v3284_v60 = vpop.f32.mrf.mxu1 }
 0x136   : > { %v3267_v62 = vpop.f32.mrf.mxu0 }
 0x137   : > { %3354 = vmatprep.mubr.msk.bf16.mxu1 %vm930_vm3, %v918_v59  ;;  %v900_v0 = vpop.f32.mrf.mxu1  ;;  %3316 = vmatprep.mubr.msk.bf16.mxu0 %vm930_vm3, %v918_v59 }
 0x138   : > { %3355 = vmatmul.mubr.msk.bf16.gmra.mxu1 %vm930_vm3, %v919_v61  ;;  %3317 = vmatmul.mubr.msk.bf16.gmra.mxu0 %vm930_vm3, %v919_v61  ;;  %v921_v4 = vpack.c.bf16 %v900_v0, %v897_v57 }
 0x139   : > { %3358 = vmatprep.mubr.msk.bf16.mxu1 %vm930_vm3, %v920_v63  ;;  %3320 = vmatprep.mubr.msk.bf16.mxu0 %vm930_vm3, %v920_v63  ;;  %v3285_v3 = vpop.f32.mrf.mxu1 }
 0x140   : > { %3359 = vmatmul.mubr.msk.bf16.gmra.mxu1 %vm930_vm3, %v921_v4  ;;  %3321 = vmatmul.mubr.msk.bf16.gmra.mxu0 %vm930_vm3, %v921_v4 }
 0x141   : > { %3368 = vmatprep.mubr.msk.bf16.mxu0 %vm3809_vm0, %v3807_v1  ;;  %3386 = vmatprep.mubr.msk.bf16.mxu1 %vm3809_vm0, %v3807_v1 }
 0x1bf   : > { %v4144_v6 = vpop.f32.mrf.mxu0  ;;  %v3328_v7 = vpop.f32.mrf.mxu1 }
 0x1c0   : > { %v1220_v8 = vadd.f32 %v3328_v7, %v4142_v5 }
 0x1c1   : > { %v4147_v9 = vpop.f32.mrf.mxu0  ;;  %v1211_v10 = vpop.f32.mrf.mxu1 }
 0x1c2   : > { %v2920_v11 = vmul.f32 -1.442695, %v1220_v8  ;;  %v1212_v12 = vadd.f32 %v4142_v5, %v1211_v10 }
 0x1c3   : > { %v4150_v13 = vpop.f32.mrf.mxu0  ;;  %v3329_v14 = vpop.f32.mrf.mxu1 }
 0x1c4   : > { %v2918_v15 = vmul.f32 -1.442695, %v1212_v12  ;;  %v1223_v16 = vadd.f32 %v3329_v14, %v4142_v5  ;;  %3588 = vpow2.f32 %v2920_v11 }
 0x1c5   : > { %v4153_v17 = vpop.f32.mrf.mxu0  ;;  %v1214_v18 = vpop.f32.mrf.mxu1 }
 0x1c6   : > { %3590 = vpow2.f32 %v2918_v15  ;;  %v2921_v21 = vmul.f32 -1.442695, %v1223_v16  ;;  %v1215_v22 = vadd.f32 %v4142_v5, %v1214_v18 }
 0x1c8   : > { %v4155_v19 = vpop.f32.mrf.mxu0  ;;  %v3332_v20 = vpop.f32.mrf.mxu1  ;;  %3592 = vpow2.f32 %v2921_v21  ;;  %v2919_v30 = vmul.f32 -1.442695, %v1215_v22 }
 0x1c9   : > { %v1236_v27 = vadd.f32 %v3332_v20, %v4142_v5 }
 0x1ca   : > { %v4158_v23 = vpop.f32.mrf.mxu0  ;;  %v1227_v24 = vpop.f32.mrf.mxu1 }
 0x1cb   : > { %v1228_v25 = vadd.f32 %v4142_v5, %v1227_v24  ;;  %v2924_v45 = vmul.f32 -1.442695, %v1236_v27 }
 0x1cc   : > { %v4161_v26 = vpop.f32.mrf.mxu0  ;;  %v3333_v29 = vpop.f32.mrf.mxu1 }
 0x1cd   : > { %v2922_v31 = vmul.f32 -1.442695, %v1228_v25  ;;  %v1239_v32 = vadd.f32 %v3333_v29, %v4142_v5 }
 0x1ce   : > { %v4164_v33 = vpop.f32.mrf.mxu0  ;;  %v1230_v34 = vpop.f32.mrf.mxu1 }
 0x1cf   : > { %3594 = vpow2.f32 %v2922_v31  ;;  %v2925_v35 = vmul.f32 -1.442695, %v1239_v32  ;;  %v1231_v36 = vadd.f32 %v4142_v5, %v1230_v34 }
 0x1d0   : > { %v4168_v28 = vpop.f32.mrf.mxu0  ;;  %v3336_v37 = vpop.f32.mrf.mxu1  ;;  %3596 = vpow2.f32 %v2919_v30 }
 0x1d1   : > { %v2923_v38 = vmul.f32 -1.442695, %v1231_v36  ;;  %v1252_v39 = vadd.f32 %v3336_v37, %v4142_v5  ;;  %3598 = vpow2.f32 %v2925_v35  ;;  %v3589_v42 = vpop.eup %3588 }
 0x1d2   : > { %v4171_v40 = vpop.f32.mrf.mxu0  ;;  %v1243_v41 = vpop.f32.mrf.mxu1  ;;  %v1464_v51 = vadd.f32 1.0, %v3589_v42 }
 0x1d3   : > { %3600 = vpow2.f32 %v2923_v38  ;;  %v2928_v43 = vmul.f32 -1.442695, %v1252_v39  ;;  %v1244_v44 = vadd.f32 %v4142_v5, %v1243_v41  ;;  %v3591_v48 = vpop.eup %3590 }
 0x1d4   : > { %v4174_v46 = vpop.f32.mrf.mxu0  ;;  %v3337_v47 = vpop.f32.mrf.mxu1  ;;  %v1462_v56 = vadd.f32 1.0, %v3591_v48 }
 0x1d5   : > { %3602 = vpow2.f32 %v2928_v43  ;;  %v2926_v49 = vmul.f32 -1.442695, %v1244_v44  ;;  %v1255_v50 = vadd.f32 %v3337_v47, %v4142_v5  ;;  %v3593_v61 = vpop.eup %3592 }
 0x1d6   : > { %v4177_v52 = vpop.f32.mrf.mxu0  ;;  %v1246_v53 = vpop.f32.mrf.mxu1  ;;  %v1465_v10 = vadd.f32 1.0, %v3593_v61 }
 0x1d7   : > { %3604 = vpow2.f32 %v2926_v49  ;;  %v2929_v54 = vmul.f32 -1.442695, %v1255_v50  ;;  %v1247_v55 = vadd.f32 %v4142_v5, %v1246_v53 }
 0x1d8   : > { %3606 = vpow2.f32 %v2924_v45  ;;  %v3340_v57 = vpop.f32.mrf.mxu1  ;;  %v4180_v58 = vpop.f32.mrf.mxu0 }
 0x1d9   : > { %3608 = vpow2.f32 %v2929_v54  ;;  %v2927_v59 = vmul.f32 -1.442695, %v1247_v55  ;;  %v1268_v60 = vadd.f32 %v3340_v57, %v4142_v5 }
 0x1da   : > { %3610 = vrcp.f32 %v1464_v51  ;;  %v1259_v62 = vpop.f32.mrf.mxu1  ;;  %v4183_v63 = vpop.f32.mrf.mxu0 }
 0x1db   : > { %3612 = vpow2.f32 %v2927_v59  ;;  %v2932_v0 = vmul.f32 -1.442695, %v1268_v60  ;;  %v1260_v3 = vadd.f32 %v4142_v5, %v1259_v62  ;;  %v4212_v60 = vld [vmem:[%s4857_s6] ss:$0 sm:$0xff] }
 0x1dc   : > { %v3595_v4 = vpop.eup %3594  ;;  %3614 = vrcp.f32 %v1462_v56  ;;  %v3341_v7 = vpop.f32.mrf.mxu1 }
 0x1dd   : > { %v4186_v8 = vpop.f32.mrf.mxu0  ;;  %v1466_v11 = vadd.f32 1.0, %v3595_v4  ;;  %v2930_v12 = vmul.f32 -1.442695, %v1260_v3  ;;  %v1271_v14 = vadd.f32 %v3341_v7, %v4142_v5  ;;  %v3597_v15 = vpop.eup %3596  ;;  %3616 = vpow2.f32 %v2932_v0 }
 0x1de   : > { %v1262_v16 = vpop.f32.mrf.mxu1  ;;  %v3599_v20 = vpop.eup %3598  ;;  %v1463_v30 = vadd.f32 1.0, %v3597_v15  ;;  %v1032_v15 = vadd.f32 %v4144_v6, %v4212_v60  ;;  %v1040_v6 = vadd.f32 %v4212_v60, %v4158_v23 }
 0x1df   : > { %v4189_v18 = vpop.f32.mrf.mxu0  ;;  %3618 = vrcp.f32 %v1466_v11  ;;  %v2933_v21 = vmul.f32 -1.442695, %v1271_v14  ;;  %v1263_v22 = vadd.f32 %v4142_v5, %v1262_v16  ;;  %v1469_v35 = vadd.f32 1.0, %v3599_v20 }
 0x1e0   : > { %v3601_v24 = vpop.eup %3600  ;;  %3620 = vpow2.f32 %v2930_v12  ;;  %v3344_v25 = vpop.f32.mrf.mxu1 }
 0x1e1   : > { %v4192_v29 = vpop.f32.mrf.mxu0  ;;  %3622 = vrcp.f32 %v1465_v10  ;;  %v1467_v31 = vadd.f32 1.0, %v3601_v24  ;;  %v2931_v32 = vmul.f32 -1.442695, %v1263_v22  ;;  %v1284_v4 = vadd.f32 %v3344_v25, %v4142_v5 }
 0x1e2   : > { %v3603_v34 = vpop.eup %3602  ;;  %3624 = vpow2.f32 %v2933_v21  ;;  %v1275_v36 = vpop.f32.mrf.mxu1  ;;  %v1024_v24 = vadd.f32 %v4212_v60, %v4147_v9 }
 0x1e3   : > { %v4194_v27 = vpop.f32.mrf.mxu0  ;;  %3626 = vrcp.f32 %v1467_v31  ;;  %v1472_v37 = vadd.f32 1.0, %v3603_v34  ;;  %v1276_v38 = vadd.f32 %v4142_v5, %v1275_v36  ;;  %v2936_v34 = vmul.f32 -1.442695, %v1284_v4 }
 0x1e4   : > { %v3605_v39 = vpop.eup %3604  ;;  %3628 = vpow2.f32 %v2931_v32  ;;  %v3345_v41 = vpop.f32.mrf.mxu1  ;;  %v1035_v32 = vadd.f32 %v4150_v13, %v4212_v60 }
 0x1e5   : > { %v4197_v42 = vpop.f32.mrf.mxu0  ;;  %v3607_v43 = vpop.eup %3606  ;;  %3630 = vrcp.f32 %v1463_v30  ;;  %v2934_v44 = vmul.f32 -1.442695, %v1276_v38  ;;  %v1470_v47 = vadd.f32 1.0, %v3605_v39  ;;  %v1287_v55 = vadd.f32 %v3345_v41, %v4142_v5 }
 0x1e6   : > { %v3609_v45 = vpop.eup %3608  ;;  %3632 = vrcp.f32 %v1469_v35  ;;  %v1278_v48 = vpop.f32.mrf.mxu1  ;;  %v1468_v3 = vadd.f32 1.0, %v3607_v43 }
 0x1e7   : > { %v4199_v49 = vpop.f32.mrf.mxu0  ;;  %v4201_v50 = vpop.eup %3610  ;;  %3634 = vrcp.f32 %v1472_v37  ;;  %v1473_v51 = vadd.f32 1.0, %v3609_v45  ;;  %v1279_v53 = vadd.f32 %v4142_v5, %v1278_v48  ;;  %v2937_v16 = vmul.f32 -1.442695, %v1287_v55 }
 0x1e8   : > { %v3613_v54 = vpop.eup %3612  ;;  %3636 = vpow2.f32 %v2934_v44  ;;  %v3348_v56 = vpop.f32.mrf.mxu1  ;;  %v1043_v37 = vadd.f32 %v4212_v60, %v4164_v33  ;;  %v1027_v33 = vadd.f32 %v4212_v60, %v4153_v17 }
 0x1e9   : > { %v4205_v57 = vpop.f32.mrf.mxu0  ;;  %v4207_v59 = vpop.eup %3614  ;;  %3638 = vrcp.f32 %v1473_v51  ;;  %v1471_v61 = vadd.f32 1.0, %v3613_v54  ;;  %v2935_v62 = vmul.f32 -1.442695, %v1279_v53  ;;  %v1300_v0 = vadd.f32 %v3348_v56, %v4142_v5 }
 0x1ea   : > { %3640 = vrcp.f32 %v1470_v47  ;;  %v1291_v7 = vpop.f32.mrf.mxu1  ;;  %v3617_v10 = vpop.eup %3616 }
 0x1eb   : > { %3642 = vrcp.f32 %v1471_v61  ;;  %v2940_v11 = vmul.f32 -1.442695, %v1300_v0  ;;  %v1292_v12 = vadd.f32 %v4142_v5, %v1291_v7  ;;  %v4219_v21 = vpop.f32.mrf.mxu0  ;;  %v1476_v41 = vadd.f32 1.0, %v3617_v10 }
 0x1ec   : > { %v3619_v14 = vpop.eup %3618  ;;  %3644 = vpow2.f32 %v2935_v62  ;;  %v3349_v20 = vpop.f32.mrf.mxu1  ;;  %v1064_v62 = vadd.f32 %v4168_v28, %v4212_v60  ;;  %v1067_v7 = vadd.f32 %v4174_v46, %v4212_v60 }
 0x1ed   : > { %v3621_v22 = vpop.eup %3620  ;;  %3646 = vpow2.f32 %v2940_v11  ;;  %v2938_v25 = vmul.f32 -1.442695, %v1292_v12  ;;  %v1303_v30 = vadd.f32 %v3349_v20, %v4142_v5  ;;  %v1574_v13 = vmul.f32 %v3619_v14, %v1040_v6  ;;  %v4231_v45 = vpop.f32.mrf.mxu0 }
 0x1ee   : > { %v3623_v31 = vpop.eup %3622  ;;  %3648 = vrcp.f32 %v1468_v3  ;;  %v1294_v35 = vpop.f32.mrf.mxu1  ;;  %v1474_v43 = vadd.f32 1.0, %v3621_v22  ;;  %v4244_v11 = vmul.f32 %v4201_v50, %v1032_v15  ;;  %v1570_v50 = vmul.f32 %v4207_v59, %v1024_v24 }
 0x1ef   : > { %v3625_v36 = vpop.eup %3624  ;;  %3650 = vpow2.f32 %v2938_v25  ;;  %v2941_v9 = vmul.f32 -1.442695, %v1303_v30  ;;  %v1295_v38 = vadd.f32 %v4142_v5, %v1294_v35  ;;  %v4236_v56 = vmul.f32 %v3623_v31, %v1035_v32  ;;  %v4246_v12 = vpop.f32.mrf.mxu0 }
 0x1f0   : > { %v3627_v39 = vpop.eup %3626  ;;  %3652 = vpow2.f32 %v2937_v16  ;;  %v3352_v44 = vpop.f32.mrf.mxu1  ;;  %v1477_v54 = vadd.f32 1.0, %v3625_v36  ;;  %v1051_v36 = vadd.f32 %v4161_v26, %v4212_v60 }
 0x1f1   : > { %v3629_v47 = vpop.eup %3628  ;;  %3654 = vpow2.f32 %v2941_v9  ;;  %v2939_v23 = vmul.f32 -1.442695, %v1295_v38  ;;  %v1316_v48 = vadd.f32 %v3352_v44, %v4142_v5  ;;  %v1575_v51 = vmul.f32 %v3627_v39, %v1043_v37  ;;  %v4262_v59 = vpop.f32.mrf.mxu0 }
 0x1f2   : > { %v3631_v53 = vpop.eup %3630  ;;  %3656 = vpow2.f32 %v2936_v34  ;;  %v1307_v55 = vpop.f32.mrf.mxu1  ;;  %v1475_v10 = vadd.f32 1.0, %v3629_v47  ;;  %v1607_v46 = vpack.c.bf16 %v4236_v56, %v4244_v11  ;;  %v1056_v37 = vadd.f32 %v4212_v60, %v4171_v40 }
 0x1f3   : > { %v3633_v61 = vpop.eup %3632  ;;  %3658 = vpow2.f32 %v2939_v23  ;;  %v1308_v0 = vadd.f32 %v4142_v5, %v1307_v55  ;;  %v1608_v3 = vpack.c.bf16 %v1575_v51, %v1574_v13  ;;  %v2944_v16 = vmul.f32 -1.442695, %v1316_v48 }
 0x1f4   : > { %v3635_v4 = vpop.eup %3634  ;;  %3660 = vrcp.f32 %v1476_v41  ;;  %v3353_v17 = vpop.f32.mrf.mxu1  ;;  %v1571_v20 = vmul.f32 %v3631_v53, %v1027_v33  ;;  %v1059_v9 = vadd.f32 %v4212_v60, %v4177_v52  ;;  %v1048_v33 = vadd.f32 %v4155_v19, %v4212_v60 }
 0x1f5   : > { %v3637_v14 = vpop.eup %3636  ;;  %3662 = vrcp.f32 %v1474_v43  ;;  %v1319_v28 = vadd.f32 %v3353_v17, %v4142_v5  ;;  %3363 = vmatpush3.bf16.msra.mxu0 %v1608_v3  ;;  %v2942_v31 = vmul.f32 -1.442695, %v1308_v0  ;;  %v1580_v6 = vmul.f32 %v3635_v4, %v1064_v62  ;;  %v4273_v62 = vpop.f32.mrf.mxu0 }
 0x1f6   : > { %v3639_v22 = vpop.eup %3638  ;;  %3664 = vrcp.f32 %v1477_v54  ;;  %v1478_v25 = vadd.f32 1.0, %v3637_v14  ;;  %v1310_v30 = vpop.f32.mrf.mxu1  ;;  %3364 = vmatprep.subr.bf16.mxu0 %v3807_v1  ;;  %v1606_v43 = vpack.c.bf16 %v1571_v20, %v1570_v50  ;;  %v1577_v55 = vmul.f32 %v3633_v61, %v1051_v36 }
 0x1f7   : > { %v3641_v15 = vpop.eup %3640  ;;  %v1311_v32 = vadd.f32 %v4142_v5, %v1310_v30  ;;  %v1581_v34 = vmul.f32 %v3639_v22, %v1067_v7  ;;  %3666 = vrcp.f32 %v1475_v10  ;;  %v2945_v39 = vmul.f32 -1.442695, %v1319_v28 }
 0x1f8   : > { %v3643_v35 = vpop.eup %3642  ;;  %v4260_v38 = vpop.f32.mrf.mxu1  ;;  %3668 = vpow2.f32 %v2944_v16  ;;  %v4268_v51 = vmul.f32 %v3641_v15, %v1056_v37 }
 0x1f9   : > { %v3645_v24 = vpop.eup %3644  ;;  %3365 = vmatpush3.bf16.msra.mxu0 %v1607_v46  ;;  %v1611_v41 = vpack.c.bf16 %v1581_v34, %v1580_v6  ;;  %3670 = vrcp.f32 %v1478_v25  ;;  %v2943_v13 = vmul.f32 -1.442695, %v1311_v32  ;;  %v4265_v40 = vmul.f32 %v3643_v35, %v1059_v9  ;;  %v4283_v46 = vpop.f32.mrf.mxu0 }
 0x1fa   : > { %v3647_v44 = vpop.eup %3646  ;;  %v1479_v26 = vadd.f32 1.0, %v3645_v24  ;;  %v1323_v47 = vpop.f32.mrf.mxu1  ;;  %3366 = vmatprep.subr.bf16.mxu0 %v3807_v1  ;;  %3672 = vpow2.f32 %v2942_v31  ;;  %v1332_v36 = vadd.f32 %v4260_v38, %v4142_v5 }
 0x1fb   : > { %v3649_v52 = vpop.eup %3648  ;;  %v1484_v23 = vadd.f32 1.0, %v3647_v44  ;;  %v1324_v48 = vadd.f32 %v4142_v5, %v1323_v47  ;;  %3381 = vmatpush3.bf16.msra.mxu1 %v1611_v41  ;;  %v1610_v4 = vpack.c.bf16 %v4265_v40, %v4268_v51  ;;  %v4304_v47 = vld [vmem:[%s4854_s3] sm:$0xff]  }
 0x1fc   : > { %v3651_v53 = vpop.eup %3650  ;;  %3674 = vrcp.f32 %v1479_v26  ;;  %v3357_v54 = vpop.f32.mrf.mxu1  ;;  %3382 = vmatprep.subr.bf16.mxu1 %v3807_v1  ;;  %v1576_v14 = vmul.f32 %v3649_v52, %v1048_v33 }
 0x1fd   : > { %v3653_v0 = vpop.eup %3652  ;;  %3676 = vpow2.f32 %v2945_v39  ;;  %v2946_v3 = vmul.f32 -1.442695, %v1324_v48  ;;  %3367 = vmatpush3.bf16.msra.mxu0 %v1606_v43  ;;  %v1482_v10 = vadd.f32 1.0, %v3651_v53  ;;  %v1335_v22 = vadd.f32 %v3357_v54, %v4142_v5  ;;  %v4296_v39 = vpop.f32.mrf.mxu0 }
 0x1fe   : > { %v3655_v7 = vpop.eup %3654  ;;  %3678 = vpow2.f32 %v2943_v13  ;;  %v1326_v17 = vpop.f32.mrf.mxu1  ;;  %3398 = vmatprep.subr.bf16.mxu0 %v3807_v1  ;;  %v1481_v20 = vadd.f32 1.0, %v3653_v0  ;;  %v1609_v30 = vpack.c.bf16 %v1577_v55, %v1576_v14  ;;  %v1088_v54 = vadd.f32 %v4212_v60, %v4194_v27  ;;  %v4320_v0 = vld [vmem:[%s4854_s3 + $0x8] sm:$0xff]  }
 0x1ff   : > { %v3657_v19 = vpop.eup %3656  ;;  %3680 = vrcp.f32 %v1484_v23  ;;  %v1485_v16 = vadd.f32 1.0, %v3655_v7  ;;  %v1327_v61 = vadd.f32 %v4142_v5, %v1326_v17  ;;  %3383 = vmatpush3.bf16.msra.mxu1 %v1610_v4  ;;  %v2949_v43 = vmul.f32 -1.442695, %v1335_v22 }
 0x200   : > { %v3659_v28 = vpop.eup %3658  ;;  %3682 = vpow2.f32 %v2946_v3  ;;  %v3360_v25 = vpop.f32.mrf.mxu1  ;;  %3369 = vmatmul.mubr.msk.bf16.vlgmr.msra.gmra.mxu0 %vm552_vm1, %v3979_v2  ;;  %3384 = vmatprep.subr.bf16.mxu1 %v3807_v1  ;;  %v1480_v34 = vadd.f32 1.0, %v3657_v19  ;;  %v2948_v23 = vmul.f32 -1.442695, %v1332_v36  ;;  %v1091_v55 = vadd.f32 %v4212_v60, %v4199_v49  ;;  %v4359_v36 = vld [vmem:[%s4854_s3 + $0x10] sm:$0xff]  }
 0x201   : > { %v4285_v50 = vpop.eup %3660  ;;  %3684 = vrcp.f32 %v1485_v16  ;;  %v1483_v15 = vadd.f32 1.0, %v3659_v28  ;;  %v2947_v31 = vmul.f32 -1.442695, %v1327_v61  ;;  %v1348_v32 = vadd.f32 %v3360_v25, %v4142_v5  ;;  %3372 = vmatprep.mubr.msk.bf16.mxu0 %vm3809_vm0, %v3807_v1 }
 0x202   : > { %v4290_v6 = vpop.eup %3662  ;;  %3686 = vrcp.f32 %v1482_v10  ;;  %v1339_v2 = vpop.f32.mrf.mxu1  ;;  %v1083_v49 = vadd.f32 %v4186_v8, %v4212_v60  ;;  %v1080_v19 = vadd.f32 %v4180_v58, %v4212_v60  ;;  %v1112_v22 = vadd.f32 %v4205_v57, %v4212_v60 }
 0x203   : > { %v3665_v35 = vpop.eup %3664  ;;  %3688 = vrcp.f32 %v1483_v15  ;;  %v2952_v37 = vmul.f32 -1.442695, %v1348_v32  ;;  %v1340_v9 = vadd.f32 %v4142_v5, %v1339_v2  ;;  %3385 = vmatpush3.bf16.msra.mxu1 %v1609_v30  ;;  %v1115_v8 = vadd.f32 %v4231_v45, %v4212_v60 }
 0x204   : > { %3690 = vpow2.f32 %v2947_v31  ;;  %v3361_v24 = vpop.f32.mrf.mxu1  ;;  %3416 = vmatprep.subr.bf16.mxu1 %v3807_v1  ;;  %v3667_v41 = vpop.eup %3666  ;;  %v4332_v16 = vmul.f32 %v3665_v35, %v1083_v49  ;;  %v4341_v30 = vmul.f32 %v4285_v50, %v1080_v19  ;;  %v1075_v58 = vadd.f32 %v4212_v60, %v4189_v18 }
 0x205   : > { %3692 = vrcp.f32 %v1481_v20  ;;  %v2950_v44 = vmul.f32 -1.442695, %v1340_v9  ;;  %v1351_v26 = vadd.f32 %v3361_v24, %v4142_v5  ;;  %v4299_v13 = vpop.eup %3668  ;;  %v1107_v57 = vadd.f32 %v4212_v60, %v4246_v12 }
 0x206   : > { %3694 = vpow2.f32 %v2952_v37  ;;  %v1342_v38 = vpop.f32.mrf.mxu1  ;;  %3387 = vmatmul.mubr.msk.bf16.vlgmr.msra.gmra.mxu1 %vm552_vm1, %v4304_v47  ;;  %v3671_v52 = vpop.eup %3670  ;;  %v1072_v18 = vadd.f32 %v4212_v60, %v4183_v63  ;;  %v1613_v50 = vpack.c.bf16 %v4332_v16, %v4341_v30  ;;  %v1583_v35 = vmul.f32 %v3667_v41, %v1075_v58 }
 0x207   : > { %3696 = vrcp.f32 %v1480_v34  ;;  %v2953_v48 = vmul.f32 -1.442695, %v1351_v26  ;;  %v1343_v53 = vadd.f32 %v4142_v5, %v1342_v38  ;;  %3390 = vmatprep.mubr.msk.bf16.mxu1 %vm3809_vm0, %v3807_v1  ;;  %v4311_v33 = vpop.eup %3672  ;;  %v4324_v5 = vpop.f32.mrf.mxu0  ;;  %v1586_v7 = vmul.f32 %v3671_v52, %v1088_v54 }
 0x208   : > { %3698 = vpow2.f32 %v2950_v44  ;;  %3373 = vmatmul.mubr.msk.bf16.gmra.mxu0 %vm552_vm1, %v4320_v0  ;;  %v1104_v9 = vadd.f32 %v4212_v60, %v4219_v21  ;;  %v1582_v44 = vmul.f32 %v4290_v6, %v1072_v18  ;;  %v1099_v21 = vadd.f32 %v4197_v42, %v4212_v60 }
 0x209   : > { %v3675_v3 = vpop.eup %3674  ;;  %3700 = vpow2.f32 %v2949_v43  ;;  %v2951_v4 = vmul.f32 -1.442695, %v1343_v53  ;;  %3376 = vmatprep.mubr.msk.bf16.mxu0 %vm3809_vm0, %v3807_v1  ;;  %v4334_v28 = vpop.f32.mrf.mxu0  ;;  %v1488_v43 = vadd.f32 1.0, %v4299_v13 }
 0x20a   : > { %v3677_v27 = vpop.eup %3676  ;;  %v1587_v10 = vmul.f32 %v3675_v3, %v1091_v55  ;;  %3702 = vpow2.f32 %v2953_v48  ;;  %v1612_v53 = vpack.c.bf16 %v1583_v35, %v1582_v44  ;;  %v1486_v55 = vadd.f32 1.0, %v4311_v33 }
 0x20b   : > { %v3679_v17 = vpop.eup %3678  ;;  %3704 = vpow2.f32 %v2948_v23  ;;  %v1489_v32 = vadd.f32 1.0, %v3677_v27  ;;  %v4363_v12 = vpop.f32.mrf.mxu0  ;;  %v1096_v3 = vadd.f32 %v4192_v29, %v4212_v60  ;;  %v1136_v58 = vadd.f32 %v4212_v60, %v4334_v28 }
 0x20c   : > { %v3681_v14 = vpop.eup %3680  ;;  %v1614_v61 = vpack.c.bf16 %v1587_v10, %v1586_v7  ;;  %3706 = vpow2.f32 %v2951_v4  ;;  %v1487_v52 = vadd.f32 1.0, %v3679_v17  ;;  %v1128_v28 = vadd.f32 %v4262_v59, %v4212_v60 }
 0x20d   : > { %v3683_v20 = vpop.eup %3682  ;;  %v1592_v34 = vmul.f32 %v3681_v14, %v1112_v22  ;;  %v1138_v6 = vpop.f32.mrf.mxu0 }
 0x20e   : > { %v3685_v25 = vpop.eup %3684  ;;  %v1490_v15 = vadd.f32 1.0, %v3683_v20  ;;  %3399 = vmatpush3.bf16.msra.mxu0 %v1614_v61  ;;  %3391 = vmatmul.mubr.msk.bf16.gmra.mxu1 %vm552_vm1, %v4320_v0 }
 0x20f   : > { %v3687_v31 = vpop.eup %3686  ;;  %v1593_v2 = vmul.f32 %v3685_v25, %v1115_v8  ;;  %3400 = vmatprep.subr.bf16.mxu0 %v3807_v1  ;;  %3394 = vmatprep.mubr.msk.bf16.mxu1 %vm3809_vm0, %v3807_v1  ;;  %v3322_v17 = vpop.f32.mrf.mxu0 }
 0x210   : > { %v3689_v45 = vpop.eup %3688  ;;  %3377 = vmatmul.mubr.msk.bf16.gmra.mxu0 %vm552_vm1, %v4359_v36  ;;  %3708 = vrcp.f32 %v1490_v15  ;;  %v4375_v23 = vmul.f32 %v3687_v31, %v1104_v9  ;;  %v1139_v31 = vadd.f32 %v4212_v60, %v1138_v6  ;;  %v1160_v44 = vadd.f32 %v3322_v17, %v4212_v60 }
 0x211   : > { %v3691_v37 = vpop.eup %3690  ;;  %v1617_v24 = vpack.c.bf16 %v1593_v2, %v1592_v34  ;;  %v4367_v63 = vmul.f32 %v3689_v45, %v1107_v57  ;;  %3404 = vmatprep.mubr.msk.bf16.mxu0 %vm3809_vm0, %v3807_v1  ;;  %3710 = vrcp.f32 %v1489_v32  ;;  %v1151_v8 = vpop.f32.mrf.mxu0  ;;  %v1131_v2 = vadd.f32 %v4283_v46, %v4212_v60 }
 0x212   : > { %v3693_v41 = vpop.eup %3692  ;;  %v1491_v26 = vadd.f32 1.0, %v3691_v37  ;;  %3401 = vmatpush3.bf16.msra.mxu0 %v1613_v50 }
 0x213   : > { %v3695_v38 = vpop.eup %3694  ;;  %3417 = vmatpush3.bf16.msra.mxu1 %v1617_v24  ;;  %3402 = vmatprep.subr.bf16.mxu0 %v3807_v1  ;;  %v1589_v4 = vmul.f32 %v3693_v41, %v1099_v21  ;;  %v1616_v42 = vpack.c.bf16 %v4367_v63, %v4375_v23  ;;  %v3323_v32 = vpop.f32.mrf.mxu0  ;;  %v1123_v41 = vadd.f32 %v4212_v60, %v4296_v39 }
 0x214   : > { %v3697_v48 = vpop.eup %3696  ;;  %3712 = vrcp.f32 %v1491_v26  ;;  %v1496_v13 = vadd.f32 1.0, %v3695_v38  ;;  %3418 = vmatprep.subr.bf16.mxu1 %v3807_v1  ;;  %v1163_v26 = vadd.f32 %v3323_v32, %v4212_v60  ;;  %v1120_v38 = vadd.f32 %v4212_v60, %v4273_v62 }
 0x215   : > { %v3699_v54 = vpop.eup %3698  ;;  %3714 = vrcp.f32 %v1488_v43  ;;  %v1588_v7 = vmul.f32 %v3697_v48, %v1096_v3  ;;  %v1154_v9 = vpop.f32.mrf.mxu0 }
 0x216   : > { %v3701_v27 = vpop.eup %3700  ;;  %3403 = vmatpush3.bf16.msra.mxu0 %v1612_v53  ;;  %3395 = vmatmul.mubr.msk.bf16.gmra.mxu1 %vm552_vm1, %v4359_v36  ;;  %3716 = vrcp.f32 %v1487_v52  ;;  %v1494_v10 = vadd.f32 1.0, %v3699_v54  ;;  %v1155_v52 = vadd.f32 %v4212_v60, %v1154_v9  ;;  %v1152_v54 = vadd.f32 %v4212_v60, %v1151_v8 }
 0x217   : > { %v3703_v49 = vpop.eup %3702  ;;  %3419 = vmatpush3.bf16.msra.mxu1 %v1616_v42  ;;  %3422 = vmatprep.mubr.msk.bf16.mxu1 %vm3809_vm0, %v3807_v1  ;;  %3718 = vrcp.f32 %v1496_v13  ;;  %v1615_v19 = vpack.c.bf16 %v1589_v4, %v1588_v7  ;;  %v1493_v61 = vadd.f32 1.0, %v3701_v27  ;;  %v1147_v27 = vadd.f32 %v4363_v12, %v4212_v60 }
 0x218   : > { %v3705_v33 = vpop.eup %3704  ;;  %v1497_v29 = vadd.f32 1.0, %v3703_v49  ;;  %3420 = vmatprep.subr.bf16.mxu1 %v3807_v1  ;;  %3434 = vmatprep.subr.bf16.mxu0 %v3807_v1  ;;  %3720 = vrcp.f32 %v1486_v55 }
 0x219   : > { %v3707_v14 = vpop.eup %3706  ;;  %3405 = vmatmul.mubr.msk.bf16.vlgmr.msra.gmra.mxu0 %vm552_vm1, %v4304_v47  ;;  %v1492_v22 = vadd.f32 1.0, %v3705_v33 }
 0x21a   : > { %3722 = vrcp.f32 %v1497_v29  ;;  %v1495_v20 = vadd.f32 1.0, %v3707_v14  ;;  %3408 = vmatprep.mubr.msk.bf16.mxu0 %vm3809_vm0, %v3807_v1 }
 0x21b   : > { %3724 = vrcp.f32 %v1494_v10  ;;  %3421 = vmatpush3.bf16.msra.mxu1 %v1615_v19  ;;  %v1144_v10 = vadd.f32 %v4324_v5, %v4212_v60  ;;  %v3586_v60 = vld [vmem:[%s4860_s9] sm:$0xff]  }
 0x21c   : > { %3726 = vrcp.f32 %v1495_v20  ;;  %3452 = vmatprep.subr.bf16.mxu1 %v3807_v1 }
 0x21d   : > { %3728 = vrcp.f32 %v1493_v61  ;;  %v3709_v25 = vpop.eup %3708 }
 0x21e   : > { %3423 = vmatmul.mubr.msk.bf16.vlgmr.msra.gmra.mxu1 %vm552_vm1, %v4304_v47  ;;  %v3711_v15 = vpop.eup %3710  ;;  %3730 = vrcp.f32 %v1492_v22  ;;  %v1598_v57 = vmul.f32 %v3709_v25, %v1136_v58 }
 0x21f   : > { %3426 = vmatprep.mubr.msk.bf16.mxu1 %vm3809_vm0, %v3807_v1  ;;  %v4410_v35 = vmul.f32 %v3711_v15, %v1131_v2 }
 0x221   : > { %v3713_v34 = vpop.eup %3712  ;;  %3409 = vmatmul.mubr.msk.bf16.gmra.mxu0 %vm552_vm1, %v4320_v0 }
 0x222   : > { %v1599_v45 = vmul.f32 %v3713_v34, %v1139_v31  ;;  %3412 = vmatprep.mubr.msk.bf16.mxu0 %vm3809_vm0, %v3807_v1  ;;  %v3715_v18 = vpop.eup %3714 }
 0x223   : > { %v3717_v50 = vpop.eup %3716  ;;  %v4414_v46 = vmul.f32 %v3715_v18, %v1128_v28 }
 0x224   : > { %v1620_v37 = vpack.c.bf16 %v1599_v45, %v1598_v57  ;;  %v3719_v24 = vpop.eup %3718  ;;  %v1595_v48 = vmul.f32 %v3717_v50, %v1123_v41 }
 0x225   : > { %v3721_v43 = vpop.eup %3720  ;;  %v1619_v21 = vpack.c.bf16 %v4410_v35, %v4414_v46  ;;  %v1604_v53 = vmul.f32 %v3719_v24, %v1160_v44 }
 0x226   : > { %3435 = vmatpush3.bf16.msra.mxu0 %v1620_v37  ;;  %3427 = vmatmul.mubr.msk.bf16.gmra.mxu1 %vm552_vm1, %v4320_v0  ;;  %v1594_v62 = vmul.f32 %v3721_v43, %v1120_v38 }
 0x227   : > { %v3723_v59 = vpop.eup %3722  ;;  %3436 = vmatprep.subr.bf16.mxu0 %v3807_v1  ;;  %3430 = vmatprep.mubr.msk.bf16.mxu1 %vm3809_vm0, %v3807_v1 }
 0x228   : > { %v3725_v39 = vpop.eup %3724  ;;  %v1605_v13 = vmul.f32 %v3723_v59, %v1163_v26  ;;  %v1618_v42 = vpack.c.bf16 %v1595_v48, %v1594_v62 }
 0x229   : > { %v3727_v6 = vpop.eup %3726  ;;  %3413 = vmatmul.mubr.msk.bf16.gmra.mxu0 %vm552_vm1, %v4359_v36  ;;  %v4438_v49 = vmul.f32 %v3725_v39, %v1152_v54 }
 0x22a   : > { %v1623_v55 = vpack.c.bf16 %v1605_v13, %v1604_v53  ;;  %v4431_v3 = vmul.f32 %v3727_v6, %v1155_v52  ;;  %3437 = vmatpush3.bf16.msra.mxu0 %v1619_v21  ;;  %3440 = vmatprep.mubr.msk.bf16.mxu0 %vm3809_vm0, %v3807_v1  ;;  %v3729_v4 = vpop.eup %3728 }
 0x22b   : > { %3438 = vmatprep.subr.bf16.mxu0 %v3807_v1  ;;  %v3731_v7 = vpop.eup %3730  ;;  %v1601_v33 = vmul.f32 %v3729_v4, %v1147_v27 }
 0x22c   : > { %3453 = vmatpush3.bf16.msra.mxu1 %v1623_v55  ;;  %v1622_v29 = vpack.c.bf16 %v4431_v3, %v4438_v49  ;;  %v1600_v12 = vmul.f32 %v3731_v7, %v1144_v10 }
 0x22d   : > { %3454 = vmatprep.subr.bf16.mxu1 %v3807_v1 }
 0x22e   : > { %3439 = vmatpush3.bf16.msra.mxu0 %v1618_v42  ;;  %3431 = vmatmul.mubr.msk.bf16.gmra.mxu1 %vm552_vm1, %v4359_v36  ;;  %v1621_v17 = vpack.c.bf16 %v1601_v33, %v1600_v12 }
 0x22f   : > { %3458 = vmatprep.mubr.msk.bf16.mxu1 %vm3809_vm0, %v3807_v1 }
 0x230   : > { %3455 = vmatpush3.bf16.msra.mxu1 %v1622_v29 }
 0x231   : > { %3441 = vmatmul.mubr.msk.bf16.vlgmr.msra.gmra.mxu0 %vm552_vm1, %v4304_v47  ;;  %3456 = vmatprep.subr.bf16.mxu1 %v3807_v1 }
 0x232   : > { %3444 = vmatprep.mubr.msk.bf16.mxu0 %vm3809_vm0, %v3807_v1 }
 0x234   : > { %3457 = vmatpush3.bf16.msra.mxu1 %v1621_v17 }
 0x235   : > { %3508 = vmatprep.subr.bf16.mxu1 %v3586_v60 }
 0x237   : > { %3459 = vmatmul.mubr.msk.bf16.vlgmr.msra.gmra.mxu1 %vm552_vm1, %v4304_v47  ;;  %v3587_v47 = vld [vmem:[%s4859_s8] sm:$0xff]  }
 0x238   : > { %3462 = vmatprep.mubr.msk.bf16.mxu1 %vm3809_vm0, %v3807_v1  ;;  %3470 = vmatprep.subr.bf16.mxu0 %v3587_v47 }
 0x239   : > { %3445 = vmatmul.mubr.msk.bf16.gmra.mxu0 %vm552_vm1, %v4320_v0  ;;  %3509 = vmatpush3.bf16.msra.mxu1 %v3586_v60 }
 0x23a   : > { %3448 = vmatprep.mubr.msk.bf16.mxu0 %vm3809_vm0, %v3807_v1  ;;  %3471 = vmatpush3.bf16.msra.mxu0 %v3587_v47 }
 0x23f   : > { %3463 = vmatmul.mubr.msk.bf16.gmra.mxu1 %vm552_vm1, %v4320_v0 }
 0x240   : > { %3466 = vmatprep.mubr.msk.bf16.mxu1 %vm3809_vm0, %v3807_v1 }
 0x241   : > { %3449 = vmatmul.mubr.msk.bf16.gmra.mxu0 %vm552_vm1, %v4359_v36 }
 0x247   : > { %3467 = vmatmul.mubr.msk.bf16.gmra.mxu1 %vm552_vm1, %v4359_v36 }
 0x2c0   : > { %v1658_v0 = vpop.f32.mrf.mxu0 }
 0x2c2   : > { %v3370_v1 = vpop.f32.mrf.mxu0 }
 0x2c4   : > { %v1661_v5 = vpop.f32.mrf.mxu0 }
 0x2c5   : > { %v1966_v14 = vpack.c.bf16 %v1661_v5, %v1658_v0 }
 0x2c6   : > { %v3371_v19 = vpop.f32.mrf.mxu0  ;;  %v1715_v61 = vpop.f32.mrf.mxu1 }
 0x2c7   : > { %3510 = vmatprep.mubr.msk.bf16.mxu1 %vm1999_vm4, %v1966_v14  ;;  %3472 = vmatprep.mubr.msk.bf16.mxu0 %vm1999_vm4, %v1966_v14 }
 0x2c8   : > { %v1666_v36 = vpop.f32.mrf.mxu0  ;;  %v3388_v20 = vpop.f32.mrf.mxu1 }
 0x2ca   : > { %v3374_v22 = vpop.f32.mrf.mxu0  ;;  %v1718_v8 = vpop.f32.mrf.mxu1 }
 0x2cb   : > { %v1969_v37 = vpack.c.bf16 %v1718_v8, %v1715_v61 }
 0x2cc   : > { %v1669_v25 = vpop.f32.mrf.mxu0  ;;  %v3389_v15 = vpop.f32.mrf.mxu1 }
 0x2cd   : > { %v1967_v58 = vpack.c.bf16 %v1669_v25, %v1666_v36 }
 0x2ce   : > { %v3375_v31 = vpop.f32.mrf.mxu0  ;;  %v1723_v32 = vpop.f32.mrf.mxu1 }
 0x2cf   : > { %3511 = vmatmul.mubr.msk.bf16.vlgmr.msra.gmra.mxu1 %vm1999_vm4, %v1967_v58  ;;  %3473 = vmatmul.mubr.msk.bf16.vlgmr.msra.gmra.mxu0 %vm1999_vm4, %v1967_v58 }
 0x2d0   : > { %v1674_v34 = vpop.f32.mrf.mxu0  ;;  %v3392_v2 = vpop.f32.mrf.mxu1 }
 0x2d2   : > { %v3378_v57 = vpop.f32.mrf.mxu0  ;;  %v1726_v45 = vpop.f32.mrf.mxu1 }
 0x2d3   : > { %v1970_v41 = vpack.c.bf16 %v1726_v45, %v1723_v32 }
 0x2d4   : > { %v1677_v18 = vpop.f32.mrf.mxu0  ;;  %v3393_v50 = vpop.f32.mrf.mxu1 }
 0x2d5   : > { %v1968_v28 = vpack.c.bf16 %v1677_v18, %v1674_v34 }
 0x2d6   : > { %v3379_v9 = vpop.f32.mrf.mxu0  ;;  %v1731_v24 = vpop.f32.mrf.mxu1 }
 0x2d7   : > { %3514 = vmatprep.mubr.msk.bf16.mxu1 %vm1999_vm4, %v1968_v28  ;;  %3476 = vmatprep.mubr.msk.bf16.mxu0 %vm1999_vm4, %v1968_v28 }
 0x2d8   : > { %3515 = vmatmul.mubr.msk.bf16.gmra.mxu1 %vm1999_vm4, %v1969_v37  ;;  %v3396_v43 = vpop.f32.mrf.mxu1  ;;  %3477 = vmatmul.mubr.msk.bf16.gmra.mxu0 %vm1999_vm4, %v1969_v37 }
 0x2d9   : > { %v1772_v44 = vpop.f32.mrf.mxu0  ;;  %3518 = vmatprep.mubr.msk.bf16.mxu1 %vm1999_vm4, %v1970_v41  ;;  %3480 = vmatprep.mubr.msk.bf16.mxu0 %vm1999_vm4, %v1970_v41 }
 0x2da   : > { %v1734_v26 = vpop.f32.mrf.mxu1 }
 0x2db   : > { %v3406_v59 = vpop.f32.mrf.mxu0  ;;  %v1971_v39 = vpack.c.bf16 %v1734_v26, %v1731_v24 }
 0x2dc   : > { %v3397_v38 = vpop.f32.mrf.mxu1 }
 0x2dd   : > { %v1775_v52 = vpop.f32.mrf.mxu0 }
 0x2de   : > { %v1829_v21 = vpop.f32.mrf.mxu1  ;;  %v1972_v48 = vpack.c.bf16 %v1775_v52, %v1772_v44 }
 0x2df   : > { %v3407_v53 = vpop.f32.mrf.mxu0 }
 0x2e0   : > { %3519 = vmatmul.mubr.msk.bf16.gmra.mxu1 %vm1999_vm4, %v1971_v39  ;;  %v3424_v13 = vpop.f32.mrf.mxu1  ;;  %3481 = vmatmul.mubr.msk.bf16.gmra.mxu0 %vm1999_vm4, %v1971_v39 }
 0x2e1   : > { %v1780_v6 = vpop.f32.mrf.mxu0  ;;  %3522 = vmatprep.mubr.msk.bf16.mxu1 %vm1999_vm4, %v1972_v48  ;;  %3484 = vmatprep.mubr.msk.bf16.mxu0 %vm1999_vm4, %v1972_v48 }
 0x2e2   : > { %v1832_v54 = vpop.f32.mrf.mxu1 }
 0x2e3   : > { %v3410_v62 = vpop.f32.mrf.mxu0  ;;  %v1975_v1 = vpack.c.bf16 %v1832_v54, %v1829_v21 }
 0x2e4   : > { %v3425_v55 = vpop.f32.mrf.mxu1 }
 0x2e5   : > { %v1783_v4 = vpop.f32.mrf.mxu0 }
 0x2e6   : > { %v1973_v42 = vpack.c.bf16 %v1783_v4, %v1780_v6  ;;  %v1837_v27 = vpop.f32.mrf.mxu1 }
 0x2e7   : > { %v3411_v7 = vpop.f32.mrf.mxu0 }
 0x2e8   : > { %3523 = vmatmul.mubr.msk.bf16.gmra.mxu1 %vm1999_vm4, %v1973_v42  ;;  %v3428_v10 = vpop.f32.mrf.mxu1  ;;  %3485 = vmatmul.mubr.msk.bf16.gmra.mxu0 %vm1999_vm4, %v1973_v42  ;;  %v4519_v7 = vld [vmem:[%s4862_s11] ss:$0 sm:$0xff] }
 0x2e9   : > { %v1788_v33 = vpop.f32.mrf.mxu0 }
 0x2ea   : > { %v1840_v29 = vpop.f32.mrf.mxu1 }
 0x2eb   : > { %v3414_v12 = vpop.f32.mrf.mxu0  ;;  %v1976_v14 = vpack.c.bf16 %v1840_v29, %v1837_v27 }
 0x2ec   : > { %v3429_v17 = vpop.f32.mrf.mxu1 }
 0x2ed   : > { %v1791_v60 = vpop.f32.mrf.mxu0 }
 0x2ee   : > { %v1974_v47 = vpack.c.bf16 %v1791_v60, %v1788_v33  ;;  %v1845_v0 = vpop.f32.mrf.mxu1 }
 0x2ef   : > { %v3415_v5 = vpop.f32.mrf.mxu0 }
 0x2f0   : > { %3526 = vmatprep.mubr.msk.bf16.mxu1 %vm1999_vm4, %v1974_v47  ;;  %v3432_v19 = vpop.f32.mrf.mxu1  ;;  %3488 = vmatprep.mubr.msk.bf16.mxu0 %vm1999_vm4, %v1974_v47 }
 0x2f1   : > { %v1886_v61 = vpop.f32.mrf.mxu0  ;;  %3527 = vmatmul.mubr.msk.bf16.gmra.mxu1 %vm1999_vm4, %v1975_v1  ;;  %3489 = vmatmul.mubr.msk.bf16.gmra.mxu0 %vm1999_vm4, %v1975_v1 }
 0x2f2   : > { %v1848_v36 = vpop.f32.mrf.mxu1  ;;  %3530 = vmatprep.mubr.msk.bf16.mxu1 %vm1999_vm4, %v1976_v14  ;;  %3492 = vmatprep.mubr.msk.bf16.mxu0 %vm1999_vm4, %v1976_v14 }
 0x2f3   : > { %v3442_v20 = vpop.f32.mrf.mxu0  ;;  %v1977_v25 = vpack.c.bf16 %v1848_v36, %v1845_v0 }
 0x2f4   : > { %v3433_v22 = vpop.f32.mrf.mxu1 }
 0x2f5   : > { %v1889_v8 = vpop.f32.mrf.mxu0 }
 0x2f6   : > { %v1978_v31 = vpack.c.bf16 %v1889_v8, %v1886_v61 }
 0x2f7   : > { %v3443_v15 = vpop.f32.mrf.mxu0  ;;  %v1943_v58 = vpop.f32.mrf.mxu1 }
 0x2f9   : > { %v1894_v32 = vpop.f32.mrf.mxu0  ;;  %3531 = vmatmul.mubr.msk.bf16.gmra.mxu1 %vm1999_vm4, %v1977_v25  ;;  %v3460_v34 = vpop.f32.mrf.mxu1  ;;  %3493 = vmatmul.mubr.msk.bf16.gmra.mxu0 %vm1999_vm4, %v1977_v25 }
 0x2fa   : > { %3534 = vmatprep.mubr.msk.bf16.mxu1 %vm1999_vm4, %v1978_v31  ;;  %3496 = vmatprep.mubr.msk.bf16.mxu0 %vm1999_vm4, %v1978_v31 }
 0x2fb   : > { %v3446_v2 = vpop.f32.mrf.mxu0  ;;  %v1946_v57 = vpop.f32.mrf.mxu1 }
 0x2fc   : > { %v1981_v38 = vpack.c.bf16 %v1946_v57, %v1943_v58 }
 0x2fd   : > { %v1897_v45 = vpop.f32.mrf.mxu0  ;;  %v3461_v18 = vpop.f32.mrf.mxu1 }
 0x2fe   : > { %v1979_v50 = vpack.c.bf16 %v1897_v45, %v1894_v32 }
 0x2ff   : > { %v3447_v28 = vpop.f32.mrf.mxu0  ;;  %v1951_v37 = vpop.f32.mrf.mxu1 }
 0x301   : > { %v1902_v9 = vpop.f32.mrf.mxu0  ;;  %3535 = vmatmul.mubr.msk.bf16.gmra.mxu1 %vm1999_vm4, %v1979_v50  ;;  %v3464_v24 = vpop.f32.mrf.mxu1  ;;  %3497 = vmatmul.mubr.msk.bf16.gmra.mxu0 %vm1999_vm4, %v1979_v50 }
 0x303   : > { %v3450_v41 = vpop.f32.mrf.mxu0  ;;  %v1954_v43 = vpop.f32.mrf.mxu1 }
 0x304   : > { %v1982_v21 = vpack.c.bf16 %v1954_v43, %v1951_v37 }
 0x305   : > { %v1905_v44 = vpop.f32.mrf.mxu0  ;;  %v3465_v26 = vpop.f32.mrf.mxu1 }
 0x306   : > { %v1980_v59 = vpack.c.bf16 %v1905_v44, %v1902_v9 }
 0x307   : > { %v1959_v52 = vpop.f32.mrf.mxu1  ;;  %v3451_v39 = vpop.f32.mrf.mxu0 }
 0x308   : > { %3538 = vmatprep.mubr.msk.bf16.mxu1 %vm1999_vm4, %v1980_v59  ;;  %3500 = vmatprep.mubr.msk.bf16.mxu0 %vm1999_vm4, %v1980_v59 }
 0x309   : > { %3539 = vmatmul.mubr.msk.bf16.gmra.mxu1 %vm1999_vm4, %v1981_v38  ;;  %v3468_v48 = vpop.f32.mrf.mxu1  ;;  %3501 = vmatmul.mubr.msk.bf16.gmra.mxu0 %vm1999_vm4, %v1981_v38 }
 0x30a   : > { %3542 = vmatprep.mubr.msk.bf16.mxu1 %vm1999_vm4, %v1982_v21  ;;  %3504 = vmatprep.mubr.msk.bf16.mxu0 %vm1999_vm4, %v1982_v21 }
 0x30b   : > { %v1962_v53 = vpop.f32.mrf.mxu1 }
 0x30c   : > { %v1983_v6 = vpack.c.bf16 %v1962_v53, %v1959_v52 }
 0x30d   : > { %v3469_v13 = vpop.f32.mrf.mxu1 }
 0x311   : > { %3543 = vmatmul.mubr.msk.bf16.gmra.mxu1 %vm1999_vm4, %v1983_v6  ;;  %3505 = vmatmul.mubr.msk.bf16.gmra.mxu0 %vm1999_vm4, %v1983_v6 }
 0x38f   : > { %v3512_v54 = vpop.f32.mrf.mxu1  ;;  %v4512_v62 = vpop.f32.mrf.mxu0 }
 0x390   : > { %v2263_v29 = vadd.f32 %v3512_v54, %v4519_v7 }
 0x391   : > { %v2256_v55 = vpop.f32.mrf.mxu1  ;;  %v2088_v4 = vpop.f32.mrf.mxu0 }
 0x392   : > { %v3012_v0 = vmul.f32 -1.442695, %v2263_v29 }
 0x393   : > { %v3513_v42 = vpop.f32.mrf.mxu1  ;;  %v4514_v27 = vpop.f32.mrf.mxu0 }
 0x394   : > { %v2266_v14 = vadd.f32 %v3513_v42, %v4519_v7  ;;  %3732 = vpow2.f32 %v3012_v0 }
 0x395   : > { %v2258_v10 = vpop.f32.mrf.mxu1  ;;  %v2090_v33 = vpop.f32.mrf.mxu0 }
 0x396   : > { %v3013_v22 = vmul.f32 -1.442695, %v2266_v14 }
 0x398   : > { %v3516_v12 = vpop.f32.mrf.mxu1  ;;  %v3478_v17 = vpop.f32.mrf.mxu0  ;;  %3734 = vpow2.f32 %v3013_v22 }
 0x39a   : > { %v2270_v60 = vpop.f32.mrf.mxu1  ;;  %v2102_v47 = vpop.f32.mrf.mxu0 }
 0x39c   : > { %v3517_v1 = vpop.f32.mrf.mxu1  ;;  %v3479_v5 = vpop.f32.mrf.mxu0 }
 0x39e   : > { %v2272_v19 = vpop.f32.mrf.mxu1  ;;  %v2104_v61 = vpop.f32.mrf.mxu0 }
 0x3a0   : > { %v3520_v36 = vpop.f32.mrf.mxu1  ;;  %v3482_v20 = vpop.f32.mrf.mxu0 }
 0x3a1   : > { %v3733_v44 = vpop.eup %3732 }
 0x3a2   : > { %v2282_v8 = vpop.f32.mrf.mxu1  ;;  %v4523_v25 = vpop.f32.mrf.mxu0  ;;  %v2411_v39 = vadd.f32 1.0, %v3733_v44 }
 0x3a3   : > { %v2283_v15 = vadd.f32 %v4519_v7, %v2282_v8 }
 0x3a4   : > { %v3521_v58 = vpop.f32.mrf.mxu1  ;;  %v3483_v31 = vpop.f32.mrf.mxu0 }
 0x3a5   : > { %v3014_v32 = vmul.f32 -1.442695, %v2283_v15  ;;  %v3735_v53 = vpop.eup %3734  ;;  %v4541_v15 = vld [vmem:[%s4861_s10] ss:$0 sm:$0xff] }
 0x3a6   : > { %v2285_v34 = vpop.f32.mrf.mxu1  ;;  %v4526_v2 = vpop.f32.mrf.mxu0  ;;  %v2412_v10 = vadd.f32 1.0, %v3735_v53 }
 0x3a7   : > { %3736 = vpow2.f32 %v3014_v32  ;;  %v2286_v57 = vadd.f32 %v4519_v7, %v2285_v34 }
 0x3a8   : > { %v3524_v45 = vpop.f32.mrf.mxu1  ;;  %v4529_v18 = vpop.f32.mrf.mxu0 }
 0x3a9   : > { %v3015_v50 = vmul.f32 -1.442695, %v2286_v57  ;;  %v2303_v28 = vadd.f32 %v3524_v45, %v4519_v7 }
 0x3aa   : > { %v2296_v37 = vpop.f32.mrf.mxu1  ;;  %v2128_v9 = vpop.f32.mrf.mxu0 }
 0x3ab   : > { %3738 = vpow2.f32 %v3015_v50  ;;  %v3016_v24 = vmul.f32 -1.442695, %v2303_v28  ;;  %v2095_v50 = vadd.f32 %v4512_v62, %v4541_v15  ;;  %v2115_v9 = vadd.f32 %v4541_v15, %v4523_v25 }
 0x3ac   : > { %v3525_v41 = vpop.f32.mrf.mxu1  ;;  %v4532_v43 = vpop.f32.mrf.mxu0 }
 0x3ad   : > { %3740 = vpow2.f32 %v3016_v24  ;;  %v2306_v26 = vadd.f32 %v3525_v41, %v4519_v7 }
 0x3ae   : > { %v2298_v59 = vpop.f32.mrf.mxu1  ;;  %v2130_v38 = vpop.f32.mrf.mxu0 }
 0x3af   : > { %v3017_v52 = vmul.f32 -1.442695, %v2306_v26 }
 0x3b1   : > { %3742 = vpow2.f32 %v3017_v52  ;;  %v3528_v21 = vpop.f32.mrf.mxu1  ;;  %v3490_v48 = vpop.f32.mrf.mxu0 }
 0x3b2   : > { %3744 = vrcp.f32 %v2411_v39 }
 0x3b3   : > { %v2310_v13 = vpop.f32.mrf.mxu1  ;;  %v2142_v6 = vpop.f32.mrf.mxu0 }
 0x3b4   : > { %v3737_v54 = vpop.eup %3736  ;;  %v2098_v6 = vadd.f32 %v4514_v27, %v4541_v15 }
 0x3b5   : > { %v2413_v55 = vadd.f32 1.0, %v3737_v54  ;;  %v3529_v4 = vpop.f32.mrf.mxu1  ;;  %v3491_v42 = vpop.f32.mrf.mxu0 }
 0x3b6   : > { %v2135_v4 = vadd.f32 %v4529_v18, %v4541_v15 }
 0x3b7   : > { %3746 = vrcp.f32 %v2413_v55  ;;  %v2312_v33 = vpop.f32.mrf.mxu1  ;;  %v2144_v29 = vpop.f32.mrf.mxu0 }
 0x3b8   : > { %v3739_v12 = vpop.eup %3738  ;;  %3748 = vrcp.f32 %v2412_v10 }
 0x3b9   : > { %v2414_v17 = vadd.f32 1.0, %v3739_v12  ;;  %v3532_v60 = vpop.f32.mrf.mxu1  ;;  %v3494_v47 = vpop.f32.mrf.mxu0 }
 0x3ba   : > { %v3741_v0 = vpop.eup %3740 }
 0x3bb   : > { %v2415_v1 = vadd.f32 1.0, %v3741_v0  ;;  %v2322_v5 = vpop.f32.mrf.mxu1  ;;  %v4535_v14 = vpop.f32.mrf.mxu0  ;;  %3750 = vrcp.f32 %v2414_v17 }
 0x3bc   : > { %v2323_v19 = vadd.f32 %v4519_v7, %v2322_v5 }
 0x3bd   : > { %3752 = vrcp.f32 %v2415_v1  ;;  %v3533_v61 = vpop.f32.mrf.mxu1  ;;  %v3495_v36 = vpop.f32.mrf.mxu0  ;;  %v2138_v1 = vadd.f32 %v4532_v43, %v4541_v15 }
 0x3be   : > { %v3743_v20 = vpop.eup %3742  ;;  %v3018_v22 = vmul.f32 -1.442695, %v2323_v19 }
 0x3bf   : > { %v2416_v8 = vadd.f32 1.0, %v3743_v20  ;;  %v2325_v58 = vpop.f32.mrf.mxu1  ;;  %v4543_v31 = vpop.f32.mrf.mxu0 }
 0x3c0   : > { %3754 = vpow2.f32 %v3018_v22  ;;  %v2326_v32 = vadd.f32 %v4519_v7, %v2325_v58  ;;  %v3745_v34 = vpop.eup %3744 }
 0x3c1   : > { %3756 = vrcp.f32 %v2416_v8  ;;  %v3536_v57 = vpop.f32.mrf.mxu1  ;;  %v4546_v45 = vpop.f32.mrf.mxu0  ;;  %v2447_v26 = vmul.f32 %v3745_v34, %v2095_v50 }
 0x3c2   : > { %v3019_v28 = vmul.f32 -1.442695, %v2326_v32  ;;  %v2343_v37 = vadd.f32 %v3536_v57, %v4519_v7 }
 0x3c3   : > { %v2336_v24 = vpop.f32.mrf.mxu1  ;;  %v2168_v41 = vpop.f32.mrf.mxu0  ;;  %v4560_v25 = vmax.f32 %v4244_v11, %v2447_v26 }
 0x3c4   : > { %v3747_v44 = vpop.eup %3746  ;;  %3758 = vpow2.f32 %v3019_v28  ;;  %v3020_v59 = vmul.f32 -1.442695, %v2343_v37 }
 0x3c5   : > { %v2449_v38 = vmul.f32 %v3747_v44, %v2115_v9  ;;  %v3537_v52 = vpop.f32.mrf.mxu1  ;;  %v4553_v39 = vpop.f32.mrf.mxu0  ;;  %v2503_v27 = vrot.slane %v4560_v25, 2  ;;  %v2489_v43 = vrot.slane %v4560_v25, 1 }
 0x3c6   : > { %3760 = vpow2.f32 %v3020_v59  ;;  %v2346_v21 = vadd.f32 %v3537_v52, %v4519_v7  ;;  %v3749_v62 = vpop.eup %3748 }
 0x3c7   : > { %v4557_v48 = vmax.f32 %v4268_v51, %v2449_v38  ;;  %v2338_v53 = vpop.f32.mrf.mxu1  ;;  %v2170_v13 = vpop.f32.mrf.mxu0  ;;  %v2448_v29 = vmul.f32 %v3749_v62, %v2098_v6  ;;  %v2118_v51 = vadd.f32 %v4541_v15, %v4526_v2  ;;  %v2517_v38 = vrot.slane %v4560_v25, 3 }
 0x3c8   : > { %v3021_v54 = vmul.f32 -1.442695, %v2346_v21  ;;  %v3751_v55 = vpop.eup %3750 }
 0x3c9   : > { %v3540_v42 = vpop.f32.mrf.mxu1  ;;  %v3502_v10 = vpop.f32.mrf.mxu0  ;;  %v2504_v12 = vrot.slane %v4557_v48, 1  ;;  %v2450_v47 = vmul.f32 %v3751_v55, %v2118_v51  ;;  %v4576_v61 = vmax.f32 %v4236_v56, %v2448_v29  ;;  %v2490_v9 = vsel %vm2478_vm6, %v4557_v48, %v2489_v43 }
 0x3ca   : > { %v3753_v33 = vpop.eup %3752  ;;  %3762 = vpow2.f32 %v3021_v54  ;;  %v2534_v42 = vrot.slane %v4557_v48, 3 }
 0x3cb   : > { %v2451_v11 = vmul.f32 %v3753_v33, %v2135_v4  ;;  %v2350_v17 = vpop.f32.mrf.mxu1  ;;  %v2182_v60 = vpop.f32.mrf.mxu0  ;;  %v2505_v36 = vsel %vm2478_vm6, %v2504_v12, %v2503_v27  ;;  %v4583_v32 = vmax.f32 %v4265_v40, %v2450_v47  ;;  %v2613_v24 = vrot.slane %v4576_v61, 1 }
 0x3cc   : > { %v2518_v40 = vrot.slane %v4557_v48, 2  ;;  %v2533_v17 = vrot.slane %v4560_v25, 4  ;;  %v2550_v60 = vrot.slane %v4557_v48, 4 }
 0x3cd   : > { %v3755_v0 = vpop.eup %3754  ;;  %v4571_v18 = vmax.f32 %v4341_v30, %v2451_v11  ;;  %v3541_v5 = vpop.f32.mrf.mxu1  ;;  %v2614_v53 = vsel %vm2478_vm6, %v4583_v32, %v2613_v24 }
 0x3ce   : > { %v3503_v19 = vpop.f32.mrf.mxu0  ;;  %v3757_v2 = vpop.eup %3756  ;;  %v2417_v34 = vadd.f32 1.0, %v3755_v0  ;;  %v2519_v4 = vsel %vm2478_vm6, %v2518_v40, %v2517_v38  ;;  %v2535_v27 = vsel %vm2478_vm6, %v2534_v42, %v2533_v17  ;;  %v2641_v38 = vrot.slane %v4576_v61, 3 }
 0x3cf   : > { %v2452_v20 = vmul.f32 %v3757_v2, %v2138_v1  ;;  %v2352_v22 = vpop.f32.mrf.mxu1  ;;  %v2506_v8 = vsel %vm2481_vm5, %v4571_v18, %v2505_v36  ;;  %v2491_v30 = vrot.slane %v4571_v18, 7  ;;  %v2536_v51 = vrot.slane %v4571_v18, 2 }
 0x3d0   : > { %v2184_v58 = vpop.f32.mrf.mxu0  ;;  %2511 = vrot.lane.b32.xlu0 %v2506_v8, %s3810_s16  ;;  %v2480_v0 = vrot.slane %v4571_v18, 6  ;;  %v2552_v5 = vrot.slane %v4571_v18, 3  ;;  %v2477_v19 = vrot.slane %v4557_v48, 7  ;;  %v2549_v2 = vrot.slane %v4560_v25, 5 }
 0x3d1   : > { %v3759_v56 = vpop.eup %3758  ;;  %v4588_v57 = vmax.f32 %v4332_v16, %v2452_v20  ;;  %v3544_v50 = vpop.f32.mrf.mxu1  ;;  %v2492_v26 = vsel %vm2481_vm5, %v2491_v30, %v2490_v9  ;;  %v2520_v16 = vrot.slane %v4571_v18, 1  ;;  %v2537_v1 = vsel %vm2481_vm5, %v2536_v51, %v2535_v27 }
 0x3d2   : > { %v3506_v28 = vpop.f32.mrf.mxu0  ;;  %v2418_v37 = vadd.f32 1.0, %v3759_v56  ;;  %v2603_v36 = vrot.slane %v4583_v32, 7  ;;  %v2479_v20 = vsel %vm2478_vm6, %v2477_v19, %v4560_v25  ;;  %v2551_v22 = vsel %vm2478_vm6, %v2550_v60, %v2549_v2 }
 0x3d3   : > { %v3761_v41 = vpop.eup %3760  ;;  %v2362_v44 = vpop.f32.mrf.mxu1  ;;  %v2615_v59 = vrot.slane %v4588_v57, 7  ;;  %v2521_v29 = vsel %vm2481_vm5, %v2520_v16, %v2519_v4  ;;  %v2566_v8 = vrot.slane %v4557_v48, 5  ;;  %v4628_v30 = vsel %vm2481_vm5, %v2480_v0, %v2479_v20 }
 0x3d4   : > { %v4598_v52 = vpop.f32.mrf.mxu0  ;;  %3764 = vrcp.f32 %v2418_v37  ;;  %v2419_v21 = vadd.f32 1.0, %v3761_v41  ;;  %v2363_v62 = vadd.f32 %v4519_v7, %v2362_v44  ;;  %2497 = vrot.lane.b32.xlu0 %v2492_v26, %s3811_s17  ;;  %v2604_v58 = vsel %vm2478_vm6, %v2603_v36, %v4576_v61 }
 0x3d5   : > { %3766 = vrcp.f32 %v2417_v34  ;;  %v3545_v13 = vpop.f32.mrf.mxu1  ;;  %v2616_v6 = vsel %vm2481_vm5, %v2615_v59, %v2614_v53  ;;  %v2553_v43 = vsel %vm2481_vm5, %v2552_v5, %v2551_v22  ;;  %v2568_v56 = vrot.slane %v4571_v18, 4 }
 0x3d6   : > { %v3507_v54 = vpop.f32.mrf.mxu0  ;;  %3768 = vrcp.f32 %v2419_v21  ;;  %v3022_v55 = vmul.f32 -1.442695, %v2363_v62  ;;  %2621 = vrot.lane.b32.xlu1 %v2616_v6, %s3811_s17  ;;  %v2158_v50 = vadd.f32 %v4541_v15, %v4543_v31  ;;  %v2565_v28 = vrot.slane %v4560_v25, 6 }
 0x3d7   : > { %v3763_v10 = vpop.eup %3762  ;;  %v2365_v33 = vpop.f32.mrf.mxu1  ;;  %v2628_v41 = vrot.slane %v4583_v32, 1  ;;  %v2155_v26 = vadd.f32 %v4541_v15, %v4535_v14  ;;  %v2627_v31 = vrot.slane %v4576_v61, 2  ;;  %v2175_v16 = vadd.f32 %v4546_v45, %v4541_v15 }
 0x3d8   : > { %v2420_v12 = vadd.f32 1.0, %v3763_v10  ;;  %3770 = vpow2.f32 %v3022_v55  ;;  %v2366_v11 = vadd.f32 %v4519_v7, %v2365_v33  ;;  %2527 = vrot.lane.b32.xlu0 %v2521_v29, %s3812_s18  ;;  %v2605_v7 = vrot.slane %v4588_v57, 6 }
 0x3d9   : > { %v2567_v40 = vsel %vm2478_vm6, %v2566_v8, %v2565_v28  ;;  %v2642_v21 = vrot.slane %v4583_v32, 2  ;;  %v2657_v62 = vrot.slane %v4576_v61, 4  ;;  %v2658_v53 = vrot.slane %v4583_v32, 3 }
 0x3da   : > { %3772 = vrcp.f32 %v2420_v12  ;;  %v3023_v47 = vmul.f32 -1.442695, %v2366_v11  ;;  %v4635_v34 = vsel %vm2481_vm5, %v2605_v7, %v2604_v58  ;;  %v2569_v59 = vsel %vm2481_vm5, %v2568_v56, %v2567_v40 }
 0x3db   : > { %v2178_v6 = vadd.f32 %v4553_v39, %v4541_v15  ;;  %v2644_v54 = vrot.slane %v4588_v57, 1  ;;  %v2660_v55 = vrot.slane %v4588_v57, 2  ;;  %v2629_v10 = vsel %vm2478_vm6, %v2628_v41, %v2627_v31 }
 0x3dc   : > { %3774 = vpow2.f32 %v3023_v47  ;;  %2543 = vrot.lane.b32.xlu0 %v2537_v1, %s3813_s19  ;;  %v2630_v29 = vsel %vm2481_vm5, %v4588_v57, %v2629_v10  ;;  %v2674_v51 = vrot.slane %v4583_v32, 4  ;;  %v2643_v39 = vsel %vm2478_vm6, %v2642_v21, %v2641_v38 }
 0x3dd   : > { %v2659_v11 = vsel %vm2478_vm6, %v2658_v53, %v2657_v62  ;;  %v2645_v60 = vsel %vm2481_vm5, %v2644_v54, %v2643_v39  ;;  %v2676_v27 = vrot.slane %v4588_v57, 3  ;;  %v2692_v53 = vrot.slane %v4588_v57, 4 }
 0x3de   : > { %v2661_v47 = vsel %vm2481_vm5, %v2660_v55, %v2659_v11  ;;  %v2197_v55 = vpop.f32.mrf.mxu0  ;;  %v2581_v10 = vrot.slane %v4560_v25, 7 }
 0x3e0   : > { %2559 = vrot.lane.b32.xlu0 %v2553_v43, %s3814_s20 }
 0x3e1   : > { %v3765_v37 = vpop.eup %3764 }
 0x3e2   : > { %v3767_v9 = vpop.eup %3766  ;;  %v2454_v24 = vmul.f32 %v3765_v37, %v2158_v50 }
 0x3e3   : > { %v3769_v44 = vpop.eup %3768  ;;  %v2453_v14 = vmul.f32 %v3767_v9, %v2155_v26 }
 0x3e4   : > { %2575 = vrot.lane.b32.xlu0 %v2569_v59, %s3815_s23  ;;  %v2466_v45 = vmax.f32 %v4367_v63, %v2454_v24  ;;  %v2455_v42 = vmul.f32 %v3769_v44, %v2175_v16  ;;  %v2673_v44 = vrot.slane %v4576_v61, 5  ;;  %v2690_v16 = vrot.slane %v4583_v32, 5 }
 0x3e5   : > { %v3771_v13 = vpop.eup %3770  ;;  %v4667_v63 = vmax.f32 %v4375_v23, %v2453_v14  ;;  %v2689_v14 = vrot.slane %v4576_v61, 6 }
 0x3e6   : > { %v2421_v4 = vadd.f32 1.0, %v3771_v13  ;;  %v4673_v1 = vmax.f32 %v4414_v46, %v2455_v42  ;;  %v2617_v19 = vrot.slane %v2466_v45, 1  ;;  %v2631_v7 = vrot.slane %v2466_v45, 2 }
 0x3e7   : > { %v3773_v33 = vpop.eup %3772  ;;  %v2646_v2 = vrot.slane %v2466_v45, 3  ;;  %v2662_v36 = vrot.slane %v2466_v45, 4  ;;  %v2678_v20 = vrot.slane %v2466_v45, 5  ;;  %v2694_v8 = vrot.slane %v2466_v45, 6 }
 0x3e8   : > { %3776 = vrcp.f32 %v2421_v4  ;;  %v2456_v12 = vmul.f32 %v3773_v33, %v2178_v6  ;;  %2635 = vrot.lane.b32.xlu0 %v2630_v29, %s3810_s16  ;;  %v2483_v37 = vrot.slane %v4673_v1, 7  ;;  %v2675_v38 = vsel %vm2478_vm6, %v2674_v51, %v2673_v44 }
 0x3e9   : > { %v3775_v17 = vpop.eup %3774  ;;  %v2677_v62 = vsel %vm2481_vm5, %v2676_v27, %v2675_v38  ;;  %v2195_v13 = vadd.f32 %v4541_v15, %v4598_v52  ;;  %v2582_v6 = vrot.slane %v4557_v48, 6  ;;  %v2508_v4 = vrot.slane %v4673_v1, 1 }
 0x3ea   : > { %v2422_v0 = vadd.f32 1.0, %v3775_v17  ;;  %v2468_v5 = vmax.f32 %v4410_v35, %v2456_v12  ;;  %v2710_v35 = vrot.slane %v2466_v45, 7  ;;  %v2484_v59 = vsel %vm2478_vm6, %v2483_v37, %v4667_v63 }
 0x3eb   : > { %v2507_v29 = vrot.slane %v4667_v63, 2  ;;  %v2584_v52 = vrot.slane %v4571_v18, 5  ;;  %v2705_v51 = vrot.slane %v4576_v61, 7  ;;  %v2198_v48 = vadd.f32 %v4541_v15, %v2197_v55 }
 0x3ec   : > { %3778 = vrcp.f32 %v2422_v0  ;;  %2651 = vrot.lane.b32.xlu0 %v2645_v60, %s3812_s18  ;;  %v2632_v23 = vrot.slane %v2468_v5, 1  ;;  %v4678_v22 = vsel %vm2478_vm6, %v2468_v5, %v2617_v19  ;;  %v2647_v58 = vrot.slane %v2468_v5, 2 }
 0x3ed   : > { %v2663_v43 = vrot.slane %v2468_v5, 3  ;;  %v2679_v56 = vrot.slane %v2468_v5, 4  ;;  %v2695_v46 = vrot.slane %v2468_v5, 5  ;;  %v2711_v28 = vrot.slane %v2468_v5, 6 }
 0x3ee   : > { %v2633_v50 = vsel %vm2478_vm6, %v2632_v23, %v2631_v7  ;;  %v4683_v9 = vsel %vm2478_vm6, %v2647_v58, %v2646_v2  ;;  %v2607_v31 = vrot.slane %v2468_v5, 7  ;;  %v2523_v39 = vrot.slane %v4673_v1, 2 }
 0x3ef   : > { %v4686_v24 = vsel %vm2478_vm6, %v2663_v43, %v2662_v36  ;;  %v4689_v40 = vsel %vm2478_vm6, %v2679_v56, %v2678_v20  ;;  %v4692_v41 = vsel %vm2478_vm6, %v2695_v46, %v2694_v8  ;;  %v4697_v26 = vsel %vm2478_vm6, %v2711_v28, %v2710_v35 }
 0x3f0   : > { %2667 = vrot.lane.b32.xlu0 %v2661_v47, %s3813_s19  ;;  %v4704_v21 = vsel %vm2478_vm6, %v2607_v31, %v2466_v45  ;;  %v2691_v45 = vsel %vm2478_vm6, %v2690_v16, %v2689_v14  ;;  %v2583_v11 = vsel %vm2478_vm6, %v2582_v6, %v2581_v10  ;;  %v2509_v17 = vsel %vm2478_vm6, %v2508_v4, %v2507_v29 }
 0x3f1   : > { %v2693_v33 = vsel %vm2481_vm5, %v2692_v53, %v2691_v45  ;;  %v2493_v60 = vrot.slane %v4667_v63, 1  ;;  %v2522_v18 = vrot.slane %v4667_v63, 3  ;;  %v2706_v61 = vrot.slane %v4583_v32, 6 }
 0x3f2   : > { %v2585_v5 = vsel %vm2481_vm5, %v2584_v52, %v2583_v11  ;;  %v2538_v19 = vrot.slane %v4667_v63, 4  ;;  %v2708_v7 = vrot.slane %v4588_v57, 5  ;;  %v2539_v8 = vrot.slane %v4673_v1, 3 }
 0x3f3   : > { %v2494_v0 = vsel %vm2478_vm6, %v4673_v1, %v2493_v60  ;;  %v2524_v36 = vsel %vm2478_vm6, %v2523_v39, %v2522_v18  ;;  %v2555_v43 = vrot.slane %v4673_v1, 4  ;;  %v2707_v14 = vsel %vm2478_vm6, %v2706_v61, %v2705_v51 }
 0x3f4   : > { %2683 = vrot.lane.b32.xlu0 %v2677_v62, %s3814_s20  ;;  %v2540_v62 = vsel %vm2478_vm6, %v2539_v8, %v2538_v19  ;;  %v2709_v6 = vsel %vm2481_vm5, %v2708_v7, %v2707_v14 }
 0x3f5   : > { %v3777_v54 = vpop.eup %3776 }
 0x3f6   : > { %v2457_v42 = vmul.f32 %v3777_v54, %v2195_v13 }
 0x3f8   : > { %v4721_v12 = vmax.f32 %v4438_v49, %v2457_v42  ;;  %2699 = vrot.lane.b32.xlu0 %v2693_v33, %s3815_s23  ;;  %v2587_v42 = vrot.slane %v4673_v1, 6  ;;  %v2586_v33 = vrot.slane %v4667_v63, 7 }
 0x3f9   : > { %v3779_v25 = vpop.eup %3778 }
 0x3fa   : > { %v2458_v47 = vmul.f32 %v3779_v25, %v2198_v48  ;;  %v2510_v49 = vsel %vm2481_vm5, %v4721_v12, %v2509_v17  ;;  %v2495_v15 = vrot.slane %v4721_v12, 7  ;;  %v2525_v27 = vrot.slane %v4721_v12, 1 }
 0x3fb   : > { %2513 = vrot.lane.b32.xlu1 %v2510_v49, %s3810_s16  ;;  %v2485_v20 = vrot.slane %v4721_v12, 6  ;;  %v2541_v58 = vrot.slane %v4721_v12, 2  ;;  %v2557_v13 = vrot.slane %v4721_v12, 3  ;;  %v2573_v55 = vrot.slane %v4721_v12, 4 }
 0x3fc   : > { %v2470_v32 = vmax.f32 %v4431_v3, %v2458_v47  ;;  %v2496_v2 = vsel %vm2481_vm5, %v2495_v15, %v2494_v0  ;;  %v2526_v23 = vsel %vm2481_vm5, %v2525_v27, %v2524_v36  ;;  %v2589_v10 = vrot.slane %v4721_v12, 5 }
 0x3fd   : > { %2499 = vrot.lane.b32.xlu0 %v2496_v2, %s3811_s17  ;;  %v4753_v44 = vsel %vm2481_vm5, %v2485_v20, %v2484_v59  ;;  %v2588_v29 = vsel %vm2478_vm6, %v2587_v42, %v2586_v33 }
 0x3fe   : > { %v2634_v57 = vsel %vm2481_vm5, %v2470_v32, %v2633_v50  ;;  %v2619_v56 = vrot.slane %v2470_v32, 7  ;;  %v2649_v3 = vrot.slane %v2470_v32, 1  ;;  %v2665_v46 = vrot.slane %v2470_v32, 2 }
 0x3ff   : > { %2529 = vrot.lane.b32.xlu1 %v2526_v23, %s3812_s18  ;;  %v2681_v35 = vrot.slane %v2470_v32, 3  ;;  %v2697_v28 = vrot.slane %v2470_v32, 4  ;;  %v2713_v37 = vrot.slane %v2470_v32, 5  ;;  %v2609_v16 = vrot.slane %v2470_v32, 6 }
 0x400   : > { %v2620_v31 = vsel %vm2481_vm5, %v2619_v56, %v4678_v22  ;;  %v2650_v38 = vsel %vm2481_vm5, %v2649_v3, %v4683_v9  ;;  %v2666_v50 = vsel %vm2481_vm5, %v2665_v46, %v4686_v24  ;;  %v2542_v9 = vsel %vm2481_vm5, %v2541_v58, %v2540_v62 }
 0x401   : > { %2591 = vrot.lane.b32.xlu0 %v2585_v5, %s3816_s26  ;;  %v2682_v53 = vsel %vm2481_vm5, %v2681_v35, %v4689_v40  ;;  %v2698_v59 = vsel %vm2481_vm5, %v2697_v28, %v4692_v41  ;;  %v2714_v22 = vsel %vm2481_vm5, %v2713_v37, %v4697_v26  ;;  %v4773_v24 = vsel %vm2481_vm5, %v2609_v16, %v4704_v21 }
 0x402   : > { %v2554_v40 = vrot.slane %v4667_v63, 5  ;;  %v2571_v26 = vrot.slane %v4673_v1, 5  ;;  %v2570_v21 = vrot.slane %v4667_v63, 6  ;;  %v2590_v52 = vsel %vm2481_vm5, %v2589_v10, %v2588_v29 }
 0x403   : > { %2545 = vrot.lane.b32.xlu1 %v2542_v9, %s3813_s19 }
 0x404   : > { %v2556_v41 = vsel %vm2478_vm6, %v2555_v43, %v2554_v40  ;;  %v2572_v4 = vsel %vm2478_vm6, %v2571_v26, %v2570_v21 }
 0x405   : > { %2715 = vrot.lane.b32.xlu0 %v2709_v6, %s3816_s26  ;;  %v2558_v54 = vsel %vm2481_vm5, %v2557_v13, %v2556_v41  ;;  %v2574_v45 = vsel %vm2481_vm5, %v2573_v55, %v2572_v4 }
 0x407   : > { %2561 = vrot.lane.b32.xlu1 %v2558_v54, %s3814_s20 }
 0x40b   : > { %2577 = vrot.lane.b32.xlu1 %v2574_v45, %s3815_s23 }
 0x40f   : > { %2593 = vrot.lane.b32.xlu1 %v2590_v52, %s3816_s26 }
 0x413   : > { %2637 = vrot.lane.b32.xlu1 %v2634_v57, %s3810_s16  ;;  %s2773_s16 = scalar_lea.vmem (%p3907_p4), %s4863_s12, %s3029_s13 }
 0x417   : > { %2623 = vrot.lane.b32.xlu1 %v2620_v31, %s3811_s17 }
 0x41b   : > { %2653 = vrot.lane.b32.xlu1 %v2650_v38, %s3812_s18 }
 0x41f   : > { %2669 = vrot.lane.b32.xlu1 %v2666_v50, %s3813_s19 }
 0x423   : > { %2685 = vrot.lane.b32.xlu1 %v2682_v53, %s3814_s20 }
 0x427   : > { %2701 = vrot.lane.b32.xlu1 %v2698_v59, %s3815_s23 }
 0x42b   : > { %2717 = vrot.lane.b32.xlu1 %v2714_v22, %s3816_s26 }
 0x442   : > { %v2512_v63 = vpop.permute.xlu0 %2511 }
 0x446   : > { %v2498_v1 = vpop.permute.xlu0 %2497 }
 0x447   : > { %v2721_v15 = vsel %vm1999_vm4, %v4628_v30, %v2498_v1 }
 0x448   : > { %v2622_v18 = vpop.permute.xlu1 %2621  ;;  %v2724_v5 = vsel %vm2723_vm7, %v2721_v15, %v2512_v63 }
 0x449   : > { %v2740_v0 = vsel %vm1999_vm4, %v4635_v34, %v2622_v18 }
 0x44a   : > { %v2528_v51 = vpop.permute.xlu0 %2527 }
 0x44b   : > { %v2726_v32 = vsel %vm552_vm1, %v2724_v5, %v2528_v51 }
 0x44e   : > { %v2544_v12 = vpop.permute.xlu0 %2543 }
 0x44f   : > { %v2729_v30 = vsel %vm2728_vm8, %v2726_v32, %v2544_v12 }
 0x452   : > { %v2560_v48 = vpop.permute.xlu0 %2559 }
 0x453   : > { %v2732_v34 = vsel %vm2731_vm9, %v2729_v30, %v2560_v48 }
 0x456   : > { %v2576_v39 = vpop.permute.xlu0 %2575 }
 0x457   : > { %v2735_v8 = vsel %vm2734_vm10, %v2732_v34, %v2576_v39 }
 0x45a   : > { %v2636_v11 = vpop.permute.xlu0 %2635 }
 0x45b   : > { %v2742_v19 = vsel %vm2723_vm7, %v2740_v0, %v2636_v11 }
 0x45e   : > { %v2652_v25 = vpop.permute.xlu0 %2651 }
 0x45f   : > { %v2744_v2 = vsel %vm552_vm1, %v2742_v19, %v2652_v25 }
 0x462   : > { %v2668_v17 = vpop.permute.xlu0 %2667 }
 0x463   : > { %v2746_v36 = vsel %vm2728_vm8, %v2744_v2, %v2668_v17 }
 0x466   : > { %v2684_v60 = vpop.permute.xlu0 %2683 }
 0x467   : > { %v2748_v23 = vsel %vm2731_vm9, %v2746_v36, %v2684_v60 }
 0x46a   : > { %v2700_v61 = vpop.permute.xlu0 %2699 }
 0x46b   : > { %v2750_v58 = vsel %vm2734_vm10, %v2748_v23, %v2700_v61 }
 0x46d   : > { %v2514_v47 = vpop.permute.xlu1 %2513 }
 0x46f   : > { %v2500_v49 = vpop.permute.xlu0 %2499 }
 0x470   : > { %v2722_v16 = vsel %vm1999_vm4, %v4753_v44, %v2500_v49 }
 0x471   : > { %v2530_v27 = vpop.permute.xlu1 %2529  ;;  %v2725_v59 = vsel %vm2723_vm7, %v2722_v16, %v2514_v47 }
 0x472   : > { %v2727_v13 = vsel %vm552_vm1, %v2725_v59, %v2530_v27 }
 0x473   : > { %v2592_v7 = vpop.permute.xlu0 %2591 }
 0x474   : > { %v2738_v57 = vsel %vm2737_vm11, %v2735_v8, %v2592_v7 }
 0x475   : > { %v2546_v20 = vpop.permute.xlu1 %2545 }
 0x476   : > { %v2730_v40 = vsel %vm2728_vm8, %v2727_v13, %v2546_v20 }
 0x477   : > { %v2716_v43 = vpop.permute.xlu0 %2715 }
 0x478   : > { %v2752_v56 = vsel %vm2737_vm11, %v2750_v58, %v2716_v43 }
 0x479   : > { %v2758_v3 = vcombine.low %v2738_v57, %v2752_v56  ;;  %v2562_v46 = vpop.permute.xlu1 %2561 }
 0x47a   : > { %v2733_v41 = vsel %vm2731_vm9, %v2730_v40, %v2562_v46 }
 0x47b   : > { %2762 = vst [vmem:[%s387_s21] sm:$0x77] %v2758_v3 }
 0x47d   : > { %v2578_v35 = vpop.permute.xlu1 %2577 }
 0x47e   : > { %v2736_v26 = vsel %vm2734_vm10, %v2733_v41, %v2578_v35 }
 0x481   : > { %v2594_v28 = vpop.permute.xlu1 %2593 }
 0x482   : > { %v2739_v55 = vsel %vm2737_vm11, %v2736_v26, %v2594_v28  ;;  %v2804_v42 = vld [vmem:[%s387_s21] sm:$0xff] (%p3907_p4) }
 0x483   : > { %2805 = vst [vmem:[%s2773_s16] sm:$0xff] (%p3907_p4), %v2804_v42 }
 0x485   : > { %v2638_v37 = vpop.permute.xlu1 %2637 }
 0x489   : > { %v2624_v31 = vpop.permute.xlu1 %2623 }
 0x48a   : > { %v2741_v53 = vsel %vm1999_vm4, %v4773_v24, %v2624_v31 }
 0x48b   : > { %v2743_v22 = vsel %vm2723_vm7, %v2741_v53, %v2638_v37 }
 0x48d   : > { %v2654_v38 = vpop.permute.xlu1 %2653 }
 0x48e   : > { %v2745_v14 = vsel %vm552_vm1, %v2743_v22, %v2654_v38 }
 0x491   : > { %v2670_v50 = vpop.permute.xlu1 %2669 }
 0x492   : > { %v2747_v6 = vsel %vm2728_vm8, %v2745_v14, %v2670_v50 }
 0x495   : > { %v2686_v62 = vpop.permute.xlu1 %2685 }
 0x496   : > { %v2749_v44 = vsel %vm2731_vm9, %v2747_v6, %v2686_v62 }
 0x499   : > { %v2702_v9 = vpop.permute.xlu1 %2701 }
 0x49a   : > { %v2751_v24 = vsel %vm2734_vm10, %v2749_v44, %v2702_v9 }
 0x49d   : > { %v2718_v54 = vpop.permute.xlu1 %2717  ;;  %2770 = sbr.rel (!%p3907_p4) target bundleno = 1194 (0x4aa), region = 72 }
 0x49e   : > { %v2753_v21 = vsel %vm2737_vm11, %v2751_v24, %v2718_v54 }
 0x49f   : > { %v2759_v4 = vcombine.low %v2739_v55, %v2753_v21 }
 0x4a1   : > { %2763 = vst [vmem:[%s387_s21 + $0x8] sm:$0x77] %v2759_v4 }
 0x4a8   : > { %v2806_v45 = vld [vmem:[%s387_s21 + $0x8] sm:$0xff] }
 0x4a9   : > { %2807 = vst [vmem:[%s2773_s16 + $0x10] sm:$0xff] %v2806_v45 }
 0x4aa PF: > { %p19_p7 = scmp.ge.s32.totalorder %s3897_s25, 4   ;;  %s4865_s21 = smov %s3801_s22 }
 0x4ab   : > { %s4866_s22 = smov %s3905_s28  ;;  %s4867_s23 = smov %s3897_s25 }
 0x4ac   :  { %21 = sbr.rel (!%p19_p7) target bundleno = 2 (0x2), region = 135 }

</bundles_post_ra>
